<compile_context>
chip_gen: v6e
topology: v6e:2x2x1
jax: 0.10.0
libtpu: 0.0.40
codegen_flags: <defaults>
</compile_context>

<pallas_src>
import functools

import jax
import jax.numpy as jnp
import numpy as np
from jax.experimental import pallas as pl
from jax.experimental.pallas import tpu as pltpu


# ---------------------------------------------------------------------------
# Small helpers
# ---------------------------------------------------------------------------

def _round_up(x, m):
    return ((x + m - 1) // m) * m


def _pad2(a, rows, cols):
    out = jnp.zeros((rows, cols), a.dtype)
    return out.at[:a.shape[0], :a.shape[1]].set(a)


def _vmem_budget_bytes():
    """Generation-aware VMEM budget: ~7/8 of physical, capped at 112 MiB."""
    cap = None
    try:
        info = pltpu.get_tpu_info()
        cap = getattr(info, "vmem_capacity_bytes", None)
    except Exception:
        cap = None
    if not cap:
        cap = 64 * 1024 * 1024          # conservative default (v7x physical VMEM)
    return min(int(cap) * 7 // 8, 112 * 1024 * 1024)


def _choose_tiling(num_nodes, vmem_budget_bytes, num_cores=2):
    """Pick (n_pad, tm, tk): large MXU/DMA tiles sized from the VMEM budget,
    while keeping >= num_cores row blocks (v7x megacore) where the graph allows,
    and avoiding >50% padding waste."""
    n0 = _round_up(max(num_nodes, 1), 128)

    # Row tile: as large as possible for grid-overhead amortization.
    tm = 128
    for cand in (1024, 512, 256, 128):
        if cand > n0:
            continue
        if _round_up(n0, cand) > n0 + n0 // 2 and cand > 128:
            continue
        if n0 >= num_cores * 128 and -(-n0 // cand) < num_cores:
            continue                     # keep >= num_cores row blocks for megacore
        tm = cand
        break

    # Column tile: ~3 in-flight adjacency tiles (Buffered(3)) within ~1/3 of VMEM.
    tk = 128
    for cand in (4096, 2048, 1024, 512, 256, 128):
        if cand > n0:
            continue
        if _round_up(n0, cand) > n0 + n0 // 2 and cand > 128:
            continue
        if 3 * tm * cand * 2 > vmem_budget_bytes // 3:
            continue
        tk = cand
        break

    n_pad = _round_up(n0, max(tm, tk))   # tm, tk are powers-of-two * 128
    return n_pad, tm, tk


def _adj_block_spec(tm, tk, index_map, deep):
    """Adjacency BlockSpec; request 3-deep pipelining when the schedule is deep
    enough for it to matter (hides uneven data-dependent DMA latency)."""
    if deep:
        try:
            return pl.BlockSpec((1, tm, tk), index_map,
                                pipeline_mode=pl.Buffered(3))
        except Exception:                # older jax without pipeline_mode/Buffered
            pass
    return pl.BlockSpec((1, tm, tk), index_map)


# ---------------------------------------------------------------------------
# Fused GCN-layer kernel (transform + block-sparse aggregate + bias/ReLU [+actor])
# ---------------------------------------------------------------------------

def _gcn_kernel(row_ref, col_ref, blk_ref, fst_ref, lst_ref, vld_ref,
                adj_ref, x_ref, w_ref, b_ref, *rest,
                x_resident, tk, fuse_actor):
    if fuse_actor:
        wa_ref, ba_ref, o_ref, acc_ref = rest
    else:
        o_ref, acc_ref = rest

    g = pl.program_id(0)
    s = pl.program_id(1)
    idx = g * pl.num_programs(1) + s

    @pl.when(fst_ref[idx] == 1)          # first scheduled block of this row block
    def _():
        acc_ref[...] = jnp.zeros_like(acc_ref)

    @pl.when(vld_ref[idx] == 1)          # skip padded schedule slots
    def _():
        if x_resident:
            c0 = pl.multiple_of(col_ref[idx] * tk, tk)
            xb = x_ref[pl.ds(c0, tk), :]
        else:
            xb = x_ref[...]
        # Fused feature transform: (tk, cin) @ (cin, h) -> bf16, f32 MXU acc.
        xw = jnp.dot(xb, w_ref[...],
                     preferred_element_type=jnp.float32).astype(jnp.bfloat16)
        # Block-sparse aggregation: (tm, tk) @ (tk, h) into the f32 accumulator.
        acc_ref[...] += jnp.dot(adj_ref[0], xw,
                                preferred_element_type=jnp.float32)

    @pl.when(lst_ref[idx] == 1)          # last scheduled block -> finalize
    def _():
        hfeat = jnp.maximum(acc_ref[...] + b_ref[...], 0.0)
        if fuse_actor:
            logits = jnp.dot(hfeat.astype(jnp.bfloat16), wa_ref[...],
                             preferred_element_type=jnp.float32) + ba_ref[...]
            o_ref[...] = logits.astype(o_ref.dtype)
        else:
            o_ref[...] = hfeat.astype(o_ref.dtype)


def _gcn_layer(graph, x_pad, w, b, wa=None, ba=None):
    """One fused pallas_call: relu(A_norm @ (X W) + b)  [@ Wa + ba if fused]."""
    n_pad, tm, tk = graph.n_pad, graph.tm, graph.tk
    G, S = graph.G, graph.S
    cin = x_pad.shape[1]
    h = w.shape[1]
    fuse_actor = wa is not None
    out_dim = wa.shape[1] if fuse_actor else h
    out_dtype = jnp.float32 if fuse_actor else jnp.bfloat16

    # Keep X/H1 fully VMEM-resident when it fits (removes the second
    # data-dependent DMA stream); budget for the pipeline's double buffer.
    x_resident = 2 * n_pad * cin * 2 <= graph.vmem_limit_bytes // 4

    def adj_map(g, s, row, col, blk, fst, lst, vld):
        return (blk[g * S + s], 0, 0)

    def out_map(g, s, row, col, blk, fst, lst, vld):
        return (row[g * S + s], 0)

    def const2(g, s, *refs):
        return (0, 0)

    if x_resident:
        x_spec = pl.BlockSpec((n_pad, cin), const2)
    else:
        def x_map(g, s, row, col, blk, fst, lst, vld):
            return (col[g * S + s], 0)
        x_spec = pl.BlockSpec((tk, cin), x_map)

    in_specs = [_adj_block_spec(tm, tk, adj_map, deep=S >= 3),
                x_spec,
                pl.BlockSpec((cin, h), const2),
                pl.BlockSpec((1, h), const2)]
    operands = [graph.adj_blocks, x_pad, w, b]
    if fuse_actor:
        in_specs += [pl.BlockSpec((h, out_dim), const2),
                     pl.BlockSpec((1, out_dim), const2)]
        operands += [wa, ba]

    nnz = graph.nnz_blocks
    flops = 2 * nnz * tk * cin * h + 2 * nnz * tm * tk * h
    if fuse_actor:
        flops += 2 * n_pad * h * out_dim
    bytes_acc = (nnz * tm * tk * 2 + n_pad * cin * 2
                 + n_pad * out_dim * (4 if fuse_actor else 2))

    kernel = functools.partial(_gcn_kernel, x_resident=x_resident, tk=tk,
                               fuse_actor=fuse_actor)

    return pl.pallas_call(
        kernel,
        out_shape=jax.ShapeDtypeStruct((n_pad, out_dim), out_dtype),
        grid_spec=pltpu.PrefetchScalarGridSpec(
            num_scalar_prefetch=6,
            grid=(G, S),
            in_specs=in_specs,
            out_specs=pl.BlockSpec((tm, out_dim), out_map),
            scratch_shapes=[pltpu.VMEM((tm, h), jnp.float32)]),
        compiler_params=pltpu.CompilerParams(
            dimension_semantics=("parallel", "arbitrary"),
            vmem_limit_bytes=graph.vmem_limit_bytes),
        cost_estimate=pl.CostEstimate(flops=int(flops), transcendentals=0,
                                      bytes_accessed=int(bytes_acc)),
    )(graph.sched_row, graph.sched_col, graph.sched_blk,
      graph.sched_first, graph.sched_last, graph.sched_valid, *operands)


# ---------------------------------------------------------------------------
# Host-side graph preparation (hoisted out of the forward; do once per graph)
# ---------------------------------------------------------------------------

class PreparedGraph:
    """Compacted nonzero adjacency tiles + flat grouped-matmul schedule."""
    def __init__(self, **kw):
        self.__dict__.update(kw)


def prepare_graph(adj_norm, num_cores=2, vmem_budget_bytes=None):
    if vmem_budget_bytes is None:
        vmem_budget_bytes = _vmem_budget_bytes()

    a = np.asarray(jax.device_get(adj_norm), dtype=np.float32)
    n = a.shape[0]
    n_pad, tm, tk = _choose_tiling(n, vmem_budget_bytes, num_cores)

    a_pad = np.zeros((n_pad, n_pad), np.float32)
    a_pad[:n, :n] = a
    nb_r, nb_c = n_pad // tm, n_pad // tk
    blocks4 = a_pad.reshape(nb_r, tm, nb_c, tk).transpose(0, 2, 1, 3)
    nz = np.abs(blocks4).sum(axis=(2, 3)) > 0.0

    # Compact nonzero adjacency tiles -> one contiguous [nnz, tm, tk] array.
    flat_ids = -np.ones((nb_r, nb_c), np.int64)
    blk_list = []
    for i in range(nb_r):
        for j in range(nb_c):
            if nz[i, j]:
                flat_ids[i, j] = len(blk_list)
                blk_list.append(blocks4[i, j])
    if not blk_list:
        blk_list.append(np.zeros((tm, tk), np.float32))
    adj_blocks = np.stack(blk_list, axis=0)

    # Flat grouped-matmul schedule, split into G row-block groups for megacore.
    G = max(1, min(num_cores, nb_r))
    per_group = [[] for _ in range(G)]
    for i in range(nb_r):
        g = i % G
        cols = np.nonzero(nz[i])[0]
        if cols.size == 0:
            # Empty row block: still finalize (writes relu(bias)); no accumulate.
            per_group[g].append((i, 0, 0, 1, 1, 0))
            continue
        for t, j in enumerate(cols):
            per_group[g].append((i, int(j), int(flat_ids[i, j]),
                                 int(t == 0), int(t == cols.size - 1), 1))

    S = max(1, max(len(p) for p in per_group))
    row = np.zeros((G, S), np.int32); col = np.zeros((G, S), np.int32)
    blk = np.zeros((G, S), np.int32); fst = np.zeros((G, S), np.int32)
    lst = np.zeros((G, S), np.int32); vld = np.zeros((G, S), np.int32)
    for g in range(G):
        steps = per_group[g] if per_group[g] else [(0, 0, 0, 0, 0, 0)]
        for s in range(S):
            if s < len(steps):
                r, c, b, f, l, v = steps[s]
            else:
                # Padded slot: repeat last entry (no extra DMA), masked via valid=0.
                r, c, b = steps[-1][0], steps[-1][1], steps[-1][2]
                f = l = v = 0
            row[g, s], col[g, s], blk[g, s] = r, c, b
            fst[g, s], lst[g, s], vld[g, s] = f, l, v

    return PreparedGraph(
        n=n, n_pad=n_pad, tm=tm, tk=tk, G=G, S=S,
        nnz_blocks=len(blk_list),
        vmem_limit_bytes=int(vmem_budget_bytes),
        adj_blocks=jnp.asarray(adj_blocks, jnp.bfloat16),
        sched_row=jnp.asarray(row.reshape(-1)),
        sched_col=jnp.asarray(col.reshape(-1)),
        sched_blk=jnp.asarray(blk.reshape(-1)),
        sched_first=jnp.asarray(fst.reshape(-1)),
        sched_last=jnp.asarray(lst.reshape(-1)),
        sched_valid=jnp.asarray(vld.reshape(-1)),
    )


# ---------------------------------------------------------------------------
# Full forward pass (pure JAX/Pallas; jittable)
# ---------------------------------------------------------------------------

def gnn_policy_forward(graph, x, params):
    """logits = Linear(relu(GCN2(relu(GCN1(x)))))  -- all matmuls in Pallas."""
    n, cin = x.shape
    hidden = params["w1"].shape[1]
    out_ch = params["wa"].shape[1]

    cin_p = _round_up(cin, 128)
    h_p = _round_up(hidden, 128)
    out_p = _round_up(out_ch, 128)

    x_b = _pad2(x.astype(jnp.float32), graph.n_pad, cin_p).astype(jnp.bfloat16)
    w1_b = _pad2(params["w1"], cin_p, h_p).astype(jnp.bfloat16)
    w2_b = _pad2(params["w2"], h_p, h_p).astype(jnp.bfloat16)
    wa_b = _pad2(params["wa"], h_p, out_p).astype(jnp.bfloat16)
    b1_p = _pad2(params["b1"].astype(jnp.float32), 1, h_p)
    b2_p = _pad2(params["b2"].astype(jnp.float32), 1, h_p)
    ba_p = _pad2(params["ba"].astype(jnp.float32), 1, out_p)

    # GCNConv 1 (fused transform + aggregate + bias + ReLU).
    h1 = _gcn_layer(graph, x_b, w1_b, b1_p)
    # GCNConv 2 + actor Linear fused into the finalize step.
    logits_p = _gcn_layer(graph, h1, w2_b, b2_p, wa=wa_b, ba=ba_p)

    return logits_p[:n, :out_ch]


# ---------------------------------------------------------------------------
# Graph / params helpers + reference
# ---------------------------------------------------------------------------

def build_normalized_adjacency(edge_index, num_nodes):
    """Dense D^-1/2 (A + I) D^-1/2, matching GCNConv's gcn_norm (undirected)."""
    # TODO(synk): edge_index scatter + densification is host/JAX preprocessing,
    # not an in-kernel gather; the kernel exploits the resulting block sparsity.
    src, dst = edge_index[0], edge_index[1]
    a = jnp.zeros((num_nodes, num_nodes), jnp.float32)
    a = a.at[dst, src].add(1.0)
    a = a + jnp.eye(num_nodes, dtype=jnp.float32)
    deg = a.sum(axis=1)
    d_inv_sqrt = jnp.where(deg > 0, 1.0 / jnp.sqrt(deg), 0.0)
    return d_inv_sqrt[:, None] * a * d_inv_sqrt[None, :]


def init_params(key, in_channels, hidden_channels, out_channels):
    k1, k2, k3 = jax.random.split(key, 3)
    scale = 0.1
    return {
        "w1": scale * jax.random.normal(k1, (in_channels, hidden_channels), jnp.float32),
        "b1": jnp.zeros((1, hidden_channels), jnp.float32),
        "w2": scale * jax.random.normal(k2, (hidden_channels, hidden_channels), jnp.float32),
        "b2": jnp.zeros((1, hidden_channels), jnp.float32),
        "wa": scale * jax.random.normal(k3, (hidden_channels, out_channels), jnp.float32),
        "ba": jnp.zeros((1, out_channels), jnp.float32),
    }


def reference_forward(adj_norm, x, params):
    h = jnp.maximum(adj_norm @ (x @ params["w1"]) + params["b1"], 0.0)
    h = jnp.maximum(adj_norm @ (h @ params["w2"]) + params["b2"], 0.0)
    return h @ params["wa"] + params["ba"]


if __name__ == "__main__":
    # Small synthetic graph: 16 nodes, undirected ring, 8 in feats, 32 hidden, 4 actions.
    num_nodes = 16
    in_channels = 8
    hidden_channels = 32
    out_channels = 4

    key = jax.random.PRNGKey(0)
    kx, kp = jax.random.split(key)

    idx = jnp.arange(num_nodes)
    nxt = (idx + 1) % num_nodes
    edge_index = jnp.stack([jnp.concatenate([idx, nxt]),
                            jnp.concatenate([nxt, idx])], axis=0)   # [2, 32]

    x = jax.random.normal(kx, (num_nodes, in_channels), jnp.float32)
    params = init_params(kp, in_channels, hidden_channels, out_channels)
    adj_norm = build_normalized_adjacency(edge_index, num_nodes)

    # Schedule / compacted adjacency blocks: built once per graph, outside the
    # forward path (no device->host sync inside the jitted forward).
    graph = prepare_graph(adj_norm)

    forward = jax.jit(lambda xx, pp: gnn_policy_forward(graph, xx, pp))
    logits = forward(x, params)
    jax.block_until_ready(logits)

    # Sanity-check against a pure-JAX f32 reference (kernel uses bf16 operands
    # with f32 accumulation, so allow a small tolerance).
    ref = reference_forward(adj_norm, x, params)
    assert logits.shape == (num_nodes, out_channels)
    assert jnp.allclose(logits, ref, atol=3e-2, rtol=3e-2), (
        "max abs diff = %f" % float(jnp.max(jnp.abs(logits - ref))))

    print("KERNEL_OK")
</pallas_src>

<mosaic_0001>
module attributes {stable_mosaic.version = 11 : i64} {
  func.func @_gcn_kernel(%arg0: i32, %arg1: i32, %arg2: memref<1xi32, #tpu.memory_space<smem>>, %arg3: memref<1xi32, #tpu.memory_space<smem>>, %arg4: memref<1xi32, #tpu.memory_space<smem>>, %arg5: memref<1xi32, #tpu.memory_space<smem>>, %arg6: memref<1xi32, #tpu.memory_space<smem>>, %arg7: memref<1xi32, #tpu.memory_space<smem>>, %arg8: memref<1x128x128xbf16, #tpu.memory_space<vmem>>, %arg9: memref<128x128xbf16, #tpu.memory_space<vmem>>, %arg10: memref<128x128xbf16, #tpu.memory_space<vmem>>, %arg11: memref<1x128xf32, #tpu.memory_space<vmem>>, %arg12: memref<128x128xbf16, #tpu.memory_space<vmem>>, %arg13: memref<128x128xf32, #tpu.memory_space<vmem>>) attributes {dimension_semantics = [#tpu.dimension_semantics<parallel>, #tpu.dimension_semantics<arbitrary>], iteration_bounds = array<i64: 1, 1>, scalar_prefetch = 6 : i64, scratch_operands = 1 : i64, tpu.core_type = #tpu.core_type<tc>, window_params = [{transform_indices = @transform_0, window_bounds = array<i64: 1, 128, 128>}, {pipeline_mode = #tpu.pipeline_mode<synchronous>, transform_indices = @transform_1, window_bounds = array<i64: 128, 128>}, {pipeline_mode = #tpu.pipeline_mode<synchronous>, transform_indices = @transform_2, window_bounds = array<i64: 128, 128>}, {pipeline_mode = #tpu.pipeline_mode<synchronous>, transform_indices = @transform_3, window_bounds = array<i64: 1, 128>}, {transform_indices = @transform_4, window_bounds = array<i64: 128, 128>}]} {
    %c1_i32 = arith.constant 1 : i32
    %0 = arith.muli %arg0, %c1_i32 : i32
    %1 = arith.addi %0, %arg1 : i32
    %2 = arith.index_cast %1 : i32 to index
    %3 = memref.load %arg5[%2] : memref<1xi32, #tpu.memory_space<smem>>
    %c1_i32_0 = arith.constant 1 : i32
    %4 = arith.cmpi eq, %3, %c1_i32_0 : i32
    %5 = arith.extui %4 : i1 to i32
    %c0_i32 = arith.constant 0 : i32
    %6 = arith.cmpi ne, %5, %c0_i32 : i32
    scf.if %6 {
      %cst = arith.constant 0.000000e+00 : f32
      %17 = vector.broadcast %cst : f32 to vector<128x128xf32>
      %c0 = arith.constant 0 : index
      %c0_5 = arith.constant 0 : index
      %18 = vector.load %arg13[%c0, %c0_5] : memref<128x128xf32, #tpu.memory_space<vmem>>, vector<128x128xf32>
      tpu.vector_store %arg13[%c0, %c0_5], %17 {strides = array<i32>} : memref<128x128xf32, #tpu.memory_space<vmem>>, vector<128x128xf32>,
    } else {
    }
    %7 = arith.index_cast %1 : i32 to index
    %8 = memref.load %arg7[%7] : memref<1xi32, #tpu.memory_space<smem>>
    %c1_i32_1 = arith.constant 1 : i32
    %9 = arith.cmpi eq, %8, %c1_i32_1 : i32
    %10 = arith.extui %9 : i1 to i32
    %c0_i32_2 = arith.constant 0 : i32
    %11 = arith.cmpi ne, %10, %c0_i32_2 : i32
    scf.if %11 {
      %17 = arith.index_cast %1 : i32 to index
      %18 = memref.load %arg3[%17] : memref<1xi32, #tpu.memory_space<smem>>
      %c128_i32 = arith.constant 128 : i32
      %19 = arith.muli %18, %c128_i32 : i32
      %20 = tpu.assume_multiple %19, 128 : i32
      %21 = arith.index_cast %20 : i32 to index
      %c0 = arith.constant 0 : index
      %22 = vector.load %arg9[%21, %c0] : memref<128x128xbf16, #tpu.memory_space<vmem>>, vector<128x128xbf16>
      %c0_5 = arith.constant 0 : index
      %c0_6 = arith.constant 0 : index
      %23 = vector.load %arg10[%c0_5, %c0_6] : memref<128x128xbf16, #tpu.memory_space<vmem>>, vector<128x128xbf16>
      %cst = arith.constant dense<0.000000e+00> : vector<128x128xf32>
      %24 = tpu.matmul %22, %23, %cst {dimension_numbers = #tpu.dot_dimension_numbers<[1], [0], [0], [1], [0, 0, 1, 1], [], []>} : vector<128x128xbf16>, vector<128x128xbf16>, vector<128x128xf32> -> vector<128x128xf32>
      %25 = arith.truncf %24 : vector<128x128xf32> to vector<128x128xbf16>
      %c0_7 = arith.constant 0 : index
      %c0_8 = arith.constant 0 : index
      %26 = vector.load %arg13[%c0_7, %c0_8] : memref<128x128xf32, #tpu.memory_space<vmem>>, vector<128x128xf32>
      %c0_9 = arith.constant 0 : index
      %c0_10 = arith.constant 0 : index
      %c0_11 = arith.constant 0 : index
      %27 = vector.load %arg8[%c0_9, %c0_10, %c0_11] : memref<1x128x128xbf16, #tpu.memory_space<vmem>>, vector<1x128x128xbf16>
      %28 = vector.shape_cast %27 : vector<1x128x128xbf16> to vector<128x128xbf16>
      %cst_12 = arith.constant dense<0.000000e+00> : vector<128x128xf32>
      %29 = tpu.matmul %28, %25, %cst_12 {dimension_numbers = #tpu.dot_dimension_numbers<[1], [0], [0], [1], [0, 0, 1, 1], [], []>} : vector<128x128xbf16>, vector<128x128xbf16>, vector<128x128xf32> -> vector<128x128xf32>
      %30 = arith.addf %26, %29 : vector<128x128xf32>
      %c0_13 = arith.constant 0 : index
      %c0_14 = arith.constant 0 : index
      %31 = vector.load %arg13[%c0_13, %c0_14] : memref<128x128xf32, #tpu.memory_space<vmem>>, vector<128x128xf32>
      tpu.vector_store %arg13[%c0_13, %c0_14], %30 {strides = array<i32>} : memref<128x128xf32, #tpu.memory_space<vmem>>, vector<128x128xf32>,
    } else {
    }
    %12 = arith.index_cast %1 : i32 to index
    %13 = memref.load %arg6[%12] : memref<1xi32, #tpu.memory_space<smem>>
    %c1_i32_3 = arith.constant 1 : i32
    %14 = arith.cmpi eq, %13, %c1_i32_3 : i32
    %15 = arith.extui %14 : i1 to i32
    %c0_i32_4 = arith.constant 0 : i32
    %16 = arith.cmpi ne, %15, %c0_i32_4 : i32
    scf.if %16 {
      %c0 = arith.constant 0 : index
      %c0_5 = arith.constant 0 : index
      %17 = vector.load %arg13[%c0, %c0_5] : memref<128x128xf32, #tpu.memory_space<vmem>>, vector<128x128xf32>
      %c0_6 = arith.constant 0 : index
      %c0_7 = arith.constant 0 : index
      %18 = vector.load %arg11[%c0_6, %c0_7] : memref<1x128xf32, #tpu.memory_space<vmem>>, vector<1x128xf32>
      %19 = vector.broadcast %18 : vector<1x128xf32> to vector<128x128xf32>
      %20 = arith.addf %17, %19 : vector<128x128xf32>
      %cst = arith.constant 0.000000e+00 : f32
      %21 = vector.broadcast %cst : f32 to vector<128x128xf32>
      %22 = arith.maximumf %20, %21 : vector<128x128xf32>
      %23 = arith.truncf %22 : vector<128x128xf32> to vector<128x128xbf16>
      %c0_8 = arith.constant 0 : index
      %c0_9 = arith.constant 0 : index
      %24 = vector.load %arg12[%c0_8, %c0_9] : memref<128x128xbf16, #tpu.memory_space<vmem>>, vector<128x128xbf16>
      tpu.vector_store %arg12[%c0_8, %c0_9], %23 {strides = array<i32>} : memref<128x128xbf16, #tpu.memory_space<vmem>>, vector<128x128xbf16>,
    } else {
    }
    return
  }
  func.func @transform_0(%arg0: i32, %arg1: i32, %arg2: memref<1xi32, #tpu.memory_space<smem>>, %arg3: memref<1xi32, #tpu.memory_space<smem>>, %arg4: memref<1xi32, #tpu.memory_space<smem>>, %arg5: memref<1xi32, #tpu.memory_space<smem>>, %arg6: memref<1xi32, #tpu.memory_space<smem>>, %arg7: memref<1xi32, #tpu.memory_space<smem>>) -> (i32, i32, i32) {
    %c1_i32 = arith.constant 1 : i32
    %0 = arith.muli %arg0, %c1_i32 : i32
    %1 = arith.addi %0, %arg1 : i32
    %2 = arith.index_cast %1 : i32 to index
    %3 = memref.load %arg4[%2] : memref<1xi32, #tpu.memory_space<smem>>
    %c0_i32 = arith.constant 0 : i32
    %c0_i32_0 = arith.constant 0 : i32
    %c0_i32_1 = arith.constant 0 : i32
    return %3, %c0_i32, %c0_i32_0 : i32, i32, i32
  }
  func.func @transform_1(%arg0: i32, %arg1: i32, %arg2: memref<1xi32, #tpu.memory_space<smem>>, %arg3: memref<1xi32, #tpu.memory_space<smem>>, %arg4: memref<1xi32, #tpu.memory_space<smem>>, %arg5: memref<1xi32, #tpu.memory_space<smem>>, %arg6: memref<1xi32, #tpu.memory_space<smem>>, %arg7: memref<1xi32, #tpu.memory_space<smem>>) -> (i32, i32) {
    %c0_i32 = arith.constant 0 : i32
    %c0_i32_0 = arith.constant 0 : i32
    %c0_i32_1 = arith.constant 0 : i32
    return %c0_i32, %c0_i32_0 : i32, i32
  }
  func.func @transform_2(%arg0: i32, %arg1: i32, %arg2: memref<1xi32, #tpu.memory_space<smem>>, %arg3: memref<1xi32, #tpu.memory_space<smem>>, %arg4: memref<1xi32, #tpu.memory_space<smem>>, %arg5: memref<1xi32, #tpu.memory_space<smem>>, %arg6: memref<1xi32, #tpu.memory_space<smem>>, %arg7: memref<1xi32, #tpu.memory_space<smem>>) -> (i32, i32) {
    %c0_i32 = arith.constant 0 : i32
    %c0_i32_0 = arith.constant 0 : i32
    %c0_i32_1 = arith.constant 0 : i32
    return %c0_i32, %c0_i32_0 : i32, i32
  }
  func.func @transform_3(%arg0: i32, %arg1: i32, %arg2: memref<1xi32, #tpu.memory_space<smem>>, %arg3: memref<1xi32, #tpu.memory_space<smem>>, %arg4: memref<1xi32, #tpu.memory_space<smem>>, %arg5: memref<1xi32, #tpu.memory_space<smem>>, %arg6: memref<1xi32, #tpu.memory_space<smem>>, %arg7: memref<1xi32, #tpu.memory_space<smem>>) -> (i32, i32) {
    %c0_i32 = arith.constant 0 : i32
    %c0_i32_0 = arith.constant 0 : i32
    %c0_i32_1 = arith.constant 0 : i32
    return %c0_i32, %c0_i32_0 : i32, i32
  }
  func.func @transform_4(%arg0: i32, %arg1: i32, %arg2: memref<1xi32, #tpu.memory_space<smem>>, %arg3: memref<1xi32, #tpu.memory_space<smem>>, %arg4: memref<1xi32, #tpu.memory_space<smem>>, %arg5: memref<1xi32, #tpu.memory_space<smem>>, %arg6: memref<1xi32, #tpu.memory_space<smem>>, %arg7: memref<1xi32, #tpu.memory_space<smem>>) -> (i32, i32) {
    %c1_i32 = arith.constant 1 : i32
    %0 = arith.muli %arg0, %c1_i32 : i32
    %1 = arith.addi %0, %arg1 : i32
    %2 = arith.index_cast %1 : i32 to index
    %3 = memref.load %arg2[%2] : memref<1xi32, #tpu.memory_space<smem>>
    %c0_i32 = arith.constant 0 : i32
    %c0_i32_0 = arith.constant 0 : i32
    return %3, %c0_i32 : i32, i32
  }
}

module attributes {stable_mosaic.version = 11 : i64} {
  func.func @_gcn_kernel(%arg0: i32, %arg1: i32, %arg2: memref<1xi32, #tpu.memory_space<smem>>, %arg3: memref<1xi32, #tpu.memory_space<smem>>, %arg4: memref<1xi32, #tpu.memory_space<smem>>, %arg5: memref<1xi32, #tpu.memory_space<smem>>, %arg6: memref<1xi32, #tpu.memory_space<smem>>, %arg7: memref<1xi32, #tpu.memory_space<smem>>, %arg8: memref<1x128x128xbf16, #tpu.memory_space<vmem>>, %arg9: memref<128x128xbf16, #tpu.memory_space<vmem>>, %arg10: memref<128x128xbf16, #tpu.memory_space<vmem>>, %arg11: memref<1x128xf32, #tpu.memory_space<vmem>>, %arg12: memref<128x128xbf16, #tpu.memory_space<vmem>>, %arg13: memref<1x128xf32, #tpu.memory_space<vmem>>, %arg14: memref<128x128xf32, #tpu.memory_space<vmem>>, %arg15: memref<128x128xf32, #tpu.memory_space<vmem>>) attributes {dimension_semantics = [#tpu.dimension_semantics<parallel>, #tpu.dimension_semantics<arbitrary>], iteration_bounds = array<i64: 1, 1>, scalar_prefetch = 6 : i64, scratch_operands = 1 : i64, tpu.core_type = #tpu.core_type<tc>, window_params = [{transform_indices = @transform_0, window_bounds = array<i64: 1, 128, 128>}, {pipeline_mode = #tpu.pipeline_mode<synchronous>, transform_indices = @transform_1, window_bounds = array<i64: 128, 128>}, {pipeline_mode = #tpu.pipeline_mode<synchronous>, transform_indices = @transform_2, window_bounds = array<i64: 128, 128>}, {pipeline_mode = #tpu.pipeline_mode<synchronous>, transform_indices = @transform_3, window_bounds = array<i64: 1, 128>}, {pipeline_mode = #tpu.pipeline_mode<synchronous>, transform_indices = @transform_4, window_bounds = array<i64: 128, 128>}, {pipeline_mode = #tpu.pipeline_mode<synchronous>, transform_indices = @transform_5, window_bounds = array<i64: 1, 128>}, {transform_indices = @transform_6, window_bounds = array<i64: 128, 128>}]} {
    %c1_i32 = arith.constant 1 : i32
    %0 = arith.muli %arg0, %c1_i32 : i32
    %1 = arith.addi %0, %arg1 : i32
    %2 = arith.index_cast %1 : i32 to index
    %3 = memref.load %arg5[%2] : memref<1xi32, #tpu.memory_space<smem>>
    %c1_i32_0 = arith.constant 1 : i32
    %4 = arith.cmpi eq, %3, %c1_i32_0 : i32
    %5 = arith.extui %4 : i1 to i32
    %c0_i32 = arith.constant 0 : i32
    %6 = arith.cmpi ne, %5, %c0_i32 : i32
    scf.if %6 {
      %cst = arith.constant 0.000000e+00 : f32
      %17 = vector.broadcast %cst : f32 to vector<128x128xf32>
      %c0 = arith.constant 0 : index
      %c0_5 = arith.constant 0 : index
      %18 = vector.load %arg15[%c0, %c0_5] : memref<128x128xf32, #tpu.memory_space<vmem>>, vector<128x128xf32>
      tpu.vector_store %arg15[%c0, %c0_5], %17 {strides = array<i32>} : memref<128x128xf32, #tpu.memory_space<vmem>>, vector<128x128xf32>,
    } else {
    }
    %7 = arith.index_cast %1 : i32 to index
    %8 = memref.load %arg7[%7] : memref<1xi32, #tpu.memory_space<smem>>
    %c1_i32_1 = arith.constant 1 : i32
    %9 = arith.cmpi eq, %8, %c1_i32_1 : i32
    %10 = arith.extui %9 : i1 to i32
    %c0_i32_2 = arith.constant 0 : i32
    %11 = arith.cmpi ne, %10, %c0_i32_2 : i32
    scf.if %11 {
      %17 = arith.index_cast %1 : i32 to index
      %18 = memref.load %arg3[%17] : memref<1xi32, #tpu.memory_space<smem>>
      %c128_i32 = arith.constant 128 : i32
      %19 = arith.muli %18, %c128_i32 : i32
      %20 = tpu.assume_multiple %19, 128 : i32
      %21 = arith.index_cast %20 : i32 to index
      %c0 = arith.constant 0 : index
      %22 = vector.load %arg9[%21, %c0] : memref<128x128xbf16, #tpu.memory_space<vmem>>, vector<128x128xbf16>
      %c0_5 = arith.constant 0 : index
      %c0_6 = arith.constant 0 : index
      %23 = vector.load %arg10[%c0_5, %c0_6] : memref<128x128xbf16, #tpu.memory_space<vmem>>, vector<128x128xbf16>
      %cst = arith.constant dense<0.000000e+00> : vector<128x128xf32>
      %24 = tpu.matmul %22, %23, %cst {dimension_numbers = #tpu.dot_dimension_numbers<[1], [0], [0], [1], [0, 0, 1, 1], [], []>} : vector<128x128xbf16>, vector<128x128xbf16>, vector<128x128xf32> -> vector<128x128xf32>
      %25 = arith.truncf %24 : vector<128x128xf32> to vector<128x128xbf16>
      %c0_7 = arith.constant 0 : index
      %c0_8 = arith.constant 0 : index
      %26 = vector.load %arg15[%c0_7, %c0_8] : memref<128x128xf32, #tpu.memory_space<vmem>>, vector<128x128xf32>
      %c0_9 = arith.constant 0 : index
      %c0_10 = arith.constant 0 : index
      %c0_11 = arith.constant 0 : index
      %27 = vector.load %arg8[%c0_9, %c0_10, %c0_11] : memref<1x128x128xbf16, #tpu.memory_space<vmem>>, vector<1x128x128xbf16>
      %28 = vector.shape_cast %27 : vector<1x128x128xbf16> to vector<128x128xbf16>
      %cst_12 = arith.constant dense<0.000000e+00> : vector<128x128xf32>
      %29 = tpu.matmul %28, %25, %cst_12 {dimension_numbers = #tpu.dot_dimension_numbers<[1], [0], [0], [1], [0, 0, 1, 1], [], []>} : vector<128x128xbf16>, vector<128x128xbf16>, vector<128x128xf32> -> vector<128x128xf32>
      %30 = arith.addf %26, %29 : vector<128x128xf32>
      %c0_13 = arith.constant 0 : index
      %c0_14 = arith.constant 0 : index
      %31 = vector.load %arg15[%c0_13, %c0_14] : memref<128x128xf32, #tpu.memory_space<vmem>>, vector<128x128xf32>
      tpu.vector_store %arg15[%c0_13, %c0_14], %30 {strides = array<i32>} : memref<128x128xf32, #tpu.memory_space<vmem>>, vector<128x128xf32>,
    } else {
    }
    %12 = arith.index_cast %1 : i32 to index
    %13 = memref.load %arg6[%12] : memref<1xi32, #tpu.memory_space<smem>>
    %c1_i32_3 = arith.constant 1 : i32
    %14 = arith.cmpi eq, %13, %c1_i32_3 : i32
    %15 = arith.extui %14 : i1 to i32
    %c0_i32_4 = arith.constant 0 : i32
    %16 = arith.cmpi ne, %15, %c0_i32_4 : i32
    scf.if %16 {
      %c0 = arith.constant 0 : index
      %c0_5 = arith.constant 0 : index
      %17 = vector.load %arg15[%c0, %c0_5] : memref<128x128xf32, #tpu.memory_space<vmem>>, vector<128x128xf32>
      %c0_6 = arith.constant 0 : index
      %c0_7 = arith.constant 0 : index
      %18 = vector.load %arg11[%c0_6, %c0_7] : memref<1x128xf32, #tpu.memory_space<vmem>>, vector<1x128xf32>
      %19 = vector.broadcast %18 : vector<1x128xf32> to vector<128x128xf32>
      %20 = arith.addf %17, %19 : vector<128x128xf32>
      %cst = arith.constant 0.000000e+00 : f32
      %21 = vector.broadcast %cst : f32 to vector<128x128xf32>
      %22 = arith.maximumf %20, %21 : vector<128x128xf32>
      %23 = arith.truncf %22 : vector<128x128xf32> to vector<128x128xbf16>
      %c0_8 = arith.constant 0 : index
      %c0_9 = arith.constant 0 : index
      %24 = vector.load %arg12[%c0_8, %c0_9] : memref<128x128xbf16, #tpu.memory_space<vmem>>, vector<128x128xbf16>
      %cst_10 = arith.constant dense<0.000000e+00> : vector<128x128xf32>
      %25 = tpu.matmul %23, %24, %cst_10 {dimension_numbers = #tpu.dot_dimension_numbers<[1], [0], [0], [1], [0, 0, 1, 1], [], []>} : vector<128x128xbf16>, vector<128x128xbf16>, vector<128x128xf32> -> vector<128x128xf32>
      %c0_11 = arith.constant 0 : index
      %c0_12 = arith.constant 0 : index
      %26 = vector.load %arg13[%c0_11, %c0_12] : memref<1x128xf32, #tpu.memory_space<vmem>>, vector<1x128xf32>
      %27 = vector.broadcast %26 : vector<1x128xf32> to vector<128x128xf32>
      %28 = arith.addf %25, %27 : vector<128x128xf32>
      %c0_13 = arith.constant 0 : index
      %c0_14 = arith.constant 0 : index
      %29 = vector.load %arg14[%c0_13, %c0_14] : memref<128x128xf32, #tpu.memory_space<vmem>>, vector<128x128xf32>
      tpu.vector_store %arg14[%c0_13, %c0_14], %28 {strides = array<i32>} : memref<128x128xf32, #tpu.memory_space<vmem>>, vector<128x128xf32>,
    } else {
    }
    return
  }
  func.func @transform_0(%arg0: i32, %arg1: i32, %arg2: memref<1xi32, #tpu.memory_space<smem>>, %arg3: memref<1xi32, #tpu.memory_space<smem>>, %arg4: memref<1xi32, #tpu.memory_space<smem>>, %arg5: memref<1xi32, #tpu.memory_space<smem>>, %arg6: memref<1xi32, #tpu.memory_space<smem>>, %arg7: memref<1xi32, #tpu.memory_space<smem>>) -> (i32, i32, i32) {
    %c1_i32 = arith.constant 1 : i32
    %0 = arith.muli %arg0, %c1_i32 : i32
    %1 = arith.addi %0, %arg1 : i32
    %2 = arith.index_cast %1 : i32 to index
    %3 = memref.load %arg4[%2] : memref<1xi32, #tpu.memory_space<smem>>
    %c0_i32 = arith.constant 0 : i32
    %c0_i32_0 = arith.constant 0 : i32
    %c0_i32_1 = arith.constant 0 : i32
    return %3, %c0_i32, %c0_i32_0 : i32, i32, i32
  }
  func.func @transform_1(%arg0: i32, %arg1: i32, %arg2: memref<1xi32, #tpu.memory_space<smem>>, %arg3: memref<1xi32, #tpu.memory_space<smem>>, %arg4: memref<1xi32, #tpu.memory_space<smem>>, %arg5: memref<1xi32, #tpu.memory_space<smem>>, %arg6: memref<1xi32, #tpu.memory_space<smem>>, %arg7: memref<1xi32, #tpu.memory_space<smem>>) -> (i32, i32) {
    %c0_i32 = arith.constant 0 : i32
    %c0_i32_0 = arith.constant 0 : i32
    %c0_i32_1 = arith.constant 0 : i32
    return %c0_i32, %c0_i32_0 : i32, i32
  }
  func.func @transform_2(%arg0: i32, %arg1: i32, %arg2: memref<1xi32, #tpu.memory_space<smem>>, %arg3: memref<1xi32, #tpu.memory_space<smem>>, %arg4: memref<1xi32, #tpu.memory_space<smem>>, %arg5: memref<1xi32, #tpu.memory_space<smem>>, %arg6: memref<1xi32, #tpu.memory_space<smem>>, %arg7: memref<1xi32, #tpu.memory_space<smem>>) -> (i32, i32) {
    %c0_i32 = arith.constant 0 : i32
    %c0_i32_0 = arith.constant 0 : i32
    %c0_i32_1 = arith.constant 0 : i32
    return %c0_i32, %c0_i32_0 : i32, i32
  }
  func.func @transform_3(%arg0: i32, %arg1: i32, %arg2: memref<1xi32, #tpu.memory_space<smem>>, %arg3: memref<1xi32, #tpu.memory_space<smem>>, %arg4: memref<1xi32, #tpu.memory_space<smem>>, %arg5: memref<1xi32, #tpu.memory_space<smem>>, %arg6: memref<1xi32, #tpu.memory_space<smem>>, %arg7: memref<1xi32, #tpu.memory_space<smem>>) -> (i32, i32) {
    %c0_i32 = arith.constant 0 : i32
    %c0_i32_0 = arith.constant 0 : i32
    %c0_i32_1 = arith.constant 0 : i32
    return %c0_i32, %c0_i32_0 : i32, i32
  }
  func.func @transform_4(%arg0: i32, %arg1: i32, %arg2: memref<1xi32, #tpu.memory_space<smem>>, %arg3: memref<1xi32, #tpu.memory_space<smem>>, %arg4: memref<1xi32, #tpu.memory_space<smem>>, %arg5: memref<1xi32, #tpu.memory_space<smem>>, %arg6: memref<1xi32, #tpu.memory_space<smem>>, %arg7: memref<1xi32, #tpu.memory_space<smem>>) -> (i32, i32) {
    %c0_i32 = arith.constant 0 : i32
    %c0_i32_0 = arith.constant 0 : i32
    %c0_i32_1 = arith.constant 0 : i32
    return %c0_i32, %c0_i32_0 : i32, i32
  }
  func.func @transform_5(%arg0: i32, %arg1: i32, %arg2: memref<1xi32, #tpu.memory_space<smem>>, %arg3: memref<1xi32, #tpu.memory_space<smem>>, %arg4: memref<1xi32, #tpu.memory_space<smem>>, %arg5: memref<1xi32, #tpu.memory_space<smem>>, %arg6: memref<1xi32, #tpu.memory_space<smem>>, %arg7: memref<1xi32, #tpu.memory_space<smem>>) -> (i32, i32) {
    %c0_i32 = arith.constant 0 : i32
    %c0_i32_0 = arith.constant 0 : i32
    %c0_i32_1 = arith.constant 0 : i32
    return %c0_i32, %c0_i32_0 : i32, i32
  }
  func.func @transform_6(%arg0: i32, %arg1: i32, %arg2: memref<1xi32, #tpu.memory_space<smem>>, %arg3: memref<1xi32, #tpu.memory_space<smem>>, %arg4: memref<1xi32, #tpu.memory_space<smem>>, %arg5: memref<1xi32, #tpu.memory_space<smem>>, %arg6: memref<1xi32, #tpu.memory_space<smem>>, %arg7: memref<1xi32, #tpu.memory_space<smem>>) -> (i32, i32) {
    %c1_i32 = arith.constant 1 : i32
    %0 = arith.muli %arg0, %c1_i32 : i32
    %1 = arith.addi %0, %arg1 : i32
    %2 = arith.index_cast %1 : i32 to index
    %3 = memref.load %arg2[%2] : memref<1xi32, #tpu.memory_space<smem>>
    %c0_i32 = arith.constant 0 : i32
    %c0_i32_0 = arith.constant 0 : i32
    return %3, %c0_i32 : i32, i32
  }
}

</mosaic_0001>

<bundles_post_ra>
// kernel: _lambda_.2
= control target key start
LH: loop header
LB: loop body
LE: loop exit
PB: predicated region body
PF: predicated region fallthrough
CT: control target
= control target key end

     0   :  { %s1092_s0 = inlined_call_operand.<no memory space> [shape: s32[1], index: 0, kind: input, shape index: {}, may-alias: {0,1,2}]   ;;  %s1093_s1 = inlined_call_operand.<no memory space> [shape: s32[1], index: 1, kind: input, shape index: {}, may-alias: {0,1,2}]   ;;  %s1094_s2 = inlined_call_operand.<no memory space> [shape: s32[1], index: 2, kind: input, shape index: {}, may-alias: {0,1,2}]   ;;  %s1095_s3 = inlined_call_operand.<no memory space> [shape: s32[1], index: 3, kind: input, shape index: {}, may-alias: {3,4,5}]   ;;  %s1096_s4 = inlined_call_operand.<no memory space> [shape: s32[1], index: 4, kind: input, shape index: {}, may-alias: {3,4,5}]   ;;  %s1097_s5 = inlined_call_operand.<no memory space> [shape: s32[1], index: 5, kind: input, shape index: {}, may-alias: {3,4,5}]   ;;  %s1098_s7 = inlined_call_operand.vmem [shape: bf16[128,128], index: 7, kind: input, shape index: {}]   ;;  %s1099_s8 = inlined_call_operand.vmem [shape: bf16[128,128], index: 8, kind: input, shape index: {}]   ;;  %s1100_s9 = inlined_call_operand.vmem [shape: f32[1,128], index: 9, kind: input, shape index: {}]   ;;  %s1101_s6 = inlined_call_operand.vmem [shape: bf16[1,128,128], index: 6, kind: input, shape index: {}]   ;;  %s1102_s10 = inlined_call_operand.vmem [shape: bf16[128,128], index: 10, kind: output, shape index: {}]  }
   0x1   :  { %16 = sst [smem:[#allocation5]] %s1093_s1  ;;  %p54_p0 = scmp.lt.s32.totalorder %s1094_s2, 0 }
   0x2   :  { %19 = sst [smem:[#allocation8]] %s1096_s4  ;;  %s726_s21 = sshll.u32 %s1092_s0, 4 }
   0x3   :  { %20 = sst [smem:[#allocation9]] %s1097_s5  ;;  %p64_p1 = scmp.lt.s32.totalorder %s726_s21, 15 }
   0x4   :  { %s1104_s2 = smov (!%p54_p0, %s1094_s2), 0  ;;  %p728_p2 = scmp.ne.s32.totalorder %s1095_s3, 1 }
   0x5   :  { %s1106_s21 = smov (!%p64_p1, %s726_s21), 15  ;;  %s774_s1 = sshll.u32 %s1104_s2, 6 }
   0x6   :  { %s1036_s28 = scalar_lea.vmem %s1101_s6, %s774_s1  ;;  %s727_s4 = sshll.u32 %s1106_s21, 2 }
   0x7   :  { %s1041_s0 = scalar_lea.vmem %s1102_s10, %s727_s4  ;;  %77 = sbr.rel (%p728_p2) target bundleno = 21 (0x15), region = 21 }
   0xc   :  { %v959_v0 = vmov 0.0  }
   0xd   :  { %78 = vst [vmem:[#allocation2 + $0x30] sm:$0xff] %v959_v0  ;;  %79 = vst [vmem:[#allocation2] sm:$0xff] %v959_v0 }
   0xe   :  { %80 = vst [vmem:[#allocation2 + $0x58] sm:$0xff] %v959_v0  ;;  %81 = vst [vmem:[#allocation2 + $0x18] sm:$0xff] %v959_v0 }
   0xf   :  { %82 = vst [vmem:[#allocation2 + $0x50] sm:$0xff] %v959_v0  ;;  %83 = vst [vmem:[#allocation2 + $0x68] sm:$0xff] %v959_v0 }
  0x10   :  { %84 = vst [vmem:[#allocation2 + $0x8] sm:$0xff] %v959_v0  ;;  %85 = vst [vmem:[#allocation2 + $0x48] sm:$0xff] %v959_v0 }
  0x11   :  { %86 = vst [vmem:[#allocation2 + $0x40] sm:$0xff] %v959_v0  ;;  %87 = vst [vmem:[#allocation2 + $0x20] sm:$0xff] %v959_v0 }
  0x12   :  { %88 = vst [vmem:[#allocation2 + $0x10] sm:$0xff] %v959_v0  ;;  %89 = vst [vmem:[#allocation2 + $0x38] sm:$0xff] %v959_v0 }
  0x13   :  { %90 = vst [vmem:[#allocation2 + $0x60] sm:$0xff] %v959_v0  ;;  %91 = vst [vmem:[#allocation2 + $0x70] sm:$0xff] %v959_v0 }
  0x14   :  { %92 = vst [vmem:[#allocation2 + $0x78] sm:$0xff] %v959_v0  ;;  %93 = vst [vmem:[#allocation2 + $0x28] sm:$0xff] %v959_v0 }
  0x15 PF:  { %s94_s2 = sld [smem:[#allocation9]] }
  0x1b   :  { %p729_p3 = scmp.ne.s32.totalorder %s94_s2, 1 }
  0x1c   :  { %s99_s17 = sld [smem:[#allocation5]] (!%p729_p3) }
  0x1d   :  { %98 = sbr.rel (%p729_p3) target bundleno = 548 (0x224), region = 25 }
  0x22   :  { %v935_v1 = vld [vmem:[%s1099_s8 + $0x38] sm:$0xff]   ;;  %v936_v2 = vld [vmem:[%s1099_s8 + $0x30] sm:$0xff]   ;;  %v937_v3 = vld [vmem:[%s1099_s8 + $0x28] sm:$0xff]   ;;  %s730_s20 = sshll.u32 %s99_s17, 7 }
  0x23   :  { %870 = vmatprep.subr.bf16.mxu0 %v935_v1  ;;  %v938_v4 = vld [vmem:[%s1099_s8 + $0x20] sm:$0xff]   ;;  %v939_v5 = vld [vmem:[%s1099_s8 + $0x18] sm:$0xff]   ;;  %s101_s21 = sshra.s32 %s730_s20, 3  ;;  %v940_v6 = vld [vmem:[%s1099_s8 + $0x10] sm:$0xff]  }
  0x24   :  { %871 = vmatpush3.bf16.msra.mxu0 %v935_v1  ;;  %s731_s24 = sshll.u32 %s101_s21, 2  ;;  %v941_v8 = vld [vmem:[%s1099_s8 + $0x8] sm:$0xff]   ;;  %v942_v9 = vld [vmem:[%s1099_s8] sm:$0xff]   ;;  %v953_v43 = vld [vmem:[%s1036_s28 + $0x10] sm:$0xff]  }
  0x25   :  { %872 = vmatprep.subr.bf16.mxu0 %v936_v2  ;;  %s104_s26 = scalar_lea.vmem %s1098_s7, %s731_s24  ;;  %v951_v17 = vld [vmem:[%s1036_s28] sm:$0xff]   ;;  %v952_v42 = vld [vmem:[%s1036_s28 + $0x8] sm:$0xff]   ;;  %v954_v44 = vld [vmem:[%s1036_s28 + $0x18] sm:$0xff]  }
  0x26   :  { %v943_v7 = vld [vmem:[%s104_s26] sm:$0xff]   ;;  %v944_v10 = vld [vmem:[%s104_s26 + $0x8] sm:$0xff]   ;;  %v945_v11 = vld [vmem:[%s104_s26 + $0x10] sm:$0xff]   ;;  %918 = vmatprep.mubr.bf16.mxu1 %v951_v17 }
  0x27   :  { %886 = vmatprep.mubr.bf16.mxu0 %v943_v7  ;;  %v946_v12 = vld [vmem:[%s104_s26 + $0x18] sm:$0xff]   ;;  %v947_v13 = vld [vmem:[%s104_s26 + $0x20] sm:$0xff]   ;;  %v948_v14 = vld [vmem:[%s104_s26 + $0x28] sm:$0xff]  }
  0x28   :  { %873 = vmatpush3.bf16.msra.mxu0 %v936_v2  ;;  %v949_v15 = vld [vmem:[%s104_s26 + $0x30] sm:$0xff]   ;;  %v950_v16 = vld [vmem:[%s104_s26 + $0x38] sm:$0xff]   ;;  %v955_v45 = vld [vmem:[%s1036_s28 + $0x20] sm:$0xff]  }
  0x29   :  { %874 = vmatprep.subr.bf16.mxu0 %v937_v3  ;;  %v956_v46 = vld [vmem:[%s1036_s28 + $0x28] sm:$0xff]   ;;  %v957_v47 = vld [vmem:[%s1036_s28 + $0x30] sm:$0xff]   ;;  %v958_v48 = vld [vmem:[%s1036_s28 + $0x38] sm:$0xff]  }
  0x2a   :  { %v340_v49 = vld [vmem:[#allocation2 + $0x58] sm:$0xff]  ;;  %v338_v51 = vld [vmem:[#allocation2 + $0x30] sm:$0xff]  ;;  %v339_v57 = vld [vmem:[#allocation2] sm:$0xff] }
  0x2b   :  { %v341_v54 = vld [vmem:[#allocation2 + $0x18] sm:$0xff]  ;;  %v344_v60 = vld [vmem:[#allocation2 + $0x8] sm:$0xff]  ;;  %v342_v63 = vld [vmem:[#allocation2 + $0x50] sm:$0xff] }
  0x2c   :  { %875 = vmatpush3.bf16.msra.mxu0 %v937_v3  ;;  %v345_v2 = vld [vmem:[#allocation2 + $0x48] sm:$0xff]  ;;  %v347_v17 = vld [vmem:[#allocation2 + $0x20] sm:$0xff] }
  0x2d   :  { %876 = vmatprep.subr.bf16.mxu0 %v938_v4 }
  0x30   :  { %877 = vmatpush3.bf16.msra.mxu0 %v938_v4 }
  0x31   :  { %878 = vmatprep.subr.bf16.mxu0 %v939_v5 }
  0x34   :  { %879 = vmatpush3.bf16.msra.mxu0 %v939_v5  ;;  %v343_v5 = vld [vmem:[#allocation2 + $0x68] sm:$0xff] }
  0x35   :  { %880 = vmatprep.subr.bf16.mxu0 %v940_v6 }
  0x38   :  { %881 = vmatpush3.bf16.msra.mxu0 %v940_v6 }
  0x39   :  { %882 = vmatprep.subr.bf16.mxu0 %v941_v8 }
  0x3c   :  { %883 = vmatpush3.bf16.msra.mxu0 %v941_v8  ;;  %v348_v8 = vld [vmem:[#allocation2 + $0x10] sm:$0xff] }
  0x3d   :  { %884 = vmatprep.subr.bf16.mxu0 %v942_v9 }
  0x40   :  { %885 = vmatpush3.bf16.msra.mxu0 %v942_v9 }
  0x43   :  { %887 = vmatmul.mubr.bf16.vlgmr.msra.gmra.mxu0 %v944_v10 }
  0x44   :  { %890 = vmatprep.mubr.bf16.mxu0 %v945_v11  ;;  %v346_v11 = vld [vmem:[#allocation2 + $0x40] sm:$0xff] }
  0x4b   :  { %891 = vmatmul.mubr.bf16.gmra.mxu0 %v946_v12 }
  0x4c   :  { %894 = vmatprep.mubr.bf16.mxu0 %v947_v13 }
  0x53   :  { %895 = vmatmul.mubr.bf16.gmra.mxu0 %v948_v14  ;;  %v349_v14 = vld [vmem:[#allocation2 + $0x38] sm:$0xff] }
  0x54   :  { %898 = vmatprep.mubr.bf16.mxu0 %v949_v15 }
  0x5b   :  { %899 = vmatmul.mubr.bf16.gmra.mxu0 %v950_v16 }
 0x103   :  { %v888_v18 = vpop.f32.mrf.mxu0 }
 0x105   :  { %v267_v19 = vpop.f32.mrf.mxu0 }
 0x107   :  { %v889_v20 = vpop.f32.mrf.mxu0 }
 0x108   :  { %v331_v40 = vpack.c.bf16 %v889_v20, %v888_v18  ;;  %v352_v20 = vld [vmem:[#allocation2 + $0x78] sm:$0xff] }
 0x109   :  { %v270_v21 = vpop.f32.mrf.mxu0 }
 0x10a   :  { %v330_v41 = vpack.c.bf16 %v270_v21, %v267_v19 }
 0x10b   :  { %v892_v22 = vpop.f32.mrf.mxu0 }
 0x10d   :  { %v283_v23 = vpop.f32.mrf.mxu0 }
 0x10f   :  { %v893_v24 = vpop.f32.mrf.mxu0 }
 0x110   :  { %v333_v38 = vpack.c.bf16 %v893_v24, %v892_v22 }
 0x111   :  { %v286_v25 = vpop.f32.mrf.mxu0 }
 0x112   :  { %v332_v39 = vpack.c.bf16 %v286_v25, %v283_v23  ;;  %v350_v23 = vld [vmem:[#allocation2 + $0x60] sm:$0xff] }
 0x113   :  { %v896_v26 = vpop.f32.mrf.mxu0 }
 0x115   :  { %v299_v27 = vpop.f32.mrf.mxu0 }
 0x117   :  { %v897_v28 = vpop.f32.mrf.mxu0 }
 0x118   :  { %v335_v36 = vpack.c.bf16 %v897_v28, %v896_v26  ;;  %v353_v26 = vld [vmem:[#allocation2 + $0x28] sm:$0xff] }
 0x119   :  { %v302_v29 = vpop.f32.mrf.mxu0 }
 0x11a   :  { %v334_v37 = vpack.c.bf16 %v302_v29, %v299_v27  ;;  %v351_v29 = vld [vmem:[#allocation2 + $0x70] sm:$0xff] }
 0x11b   :  { %v900_v30 = vpop.f32.mrf.mxu0 }
 0x11d   :  { %v315_v31 = vpop.f32.mrf.mxu0 }
 0x11f   :  { %v901_v32 = vpop.f32.mrf.mxu0 }
 0x120   :  { %v337_v33 = vpack.c.bf16 %v901_v32, %v900_v30 }
 0x121   :  { %v318_v34 = vpop.f32.mrf.mxu0 }
 0x122   :  { %v336_v35 = vpack.c.bf16 %v318_v34, %v315_v31  ;;  %902 = vmatprep.subr.bf16.mxu1 %v337_v33 }
 0x123   :  { %903 = vmatpush3.bf16.msra.mxu1 %v337_v33 }
 0x124   :  { %904 = vmatprep.subr.bf16.mxu1 %v336_v35 }
 0x127   :  { %905 = vmatpush3.bf16.msra.mxu1 %v336_v35 }
 0x128   :  { %906 = vmatprep.subr.bf16.mxu1 %v335_v36 }
 0x12b   :  { %907 = vmatpush3.bf16.msra.mxu1 %v335_v36 }
 0x12c   :  { %908 = vmatprep.subr.bf16.mxu1 %v334_v37 }
 0x12f   :  { %909 = vmatpush3.bf16.msra.mxu1 %v334_v37 }
 0x130   :  { %910 = vmatprep.subr.bf16.mxu1 %v333_v38 }
 0x133   :  { %911 = vmatpush3.bf16.msra.mxu1 %v333_v38 }
 0x134   :  { %912 = vmatprep.subr.bf16.mxu1 %v332_v39 }
 0x137   :  { %913 = vmatpush3.bf16.msra.mxu1 %v332_v39 }
 0x138   :  { %914 = vmatprep.subr.bf16.mxu1 %v331_v40 }
 0x13b   :  { %915 = vmatpush3.bf16.msra.mxu1 %v331_v40 }
 0x13c   :  { %916 = vmatprep.subr.bf16.mxu1 %v330_v41 }
 0x13f   :  { %917 = vmatpush3.bf16.msra.mxu1 %v330_v41 }
 0x142   :  { %919 = vmatmul.mubr.bf16.vlgmr.msra.gmra.mxu1 %v952_v42 }
 0x143   :  { %922 = vmatprep.mubr.bf16.mxu1 %v953_v43 }
 0x14a   :  { %923 = vmatmul.mubr.bf16.gmra.mxu1 %v954_v44 }
 0x14b   :  { %926 = vmatprep.mubr.bf16.mxu1 %v955_v45 }
 0x152   :  { %927 = vmatmul.mubr.bf16.gmra.mxu1 %v956_v46 }
 0x153   :  { %930 = vmatprep.mubr.bf16.mxu1 %v957_v47 }
 0x15a   :  { %931 = vmatmul.mubr.bf16.gmra.mxu1 %v958_v48 }
 0x202   :  { %v920_v50 = vpop.f32.mrf.mxu1 }
 0x203   :  { %v517_v52 = vadd.f32 %v920_v50, %v340_v49 }
 0x204   :  { %v452_v53 = vpop.f32.mrf.mxu1 }
 0x205   :  { %533 = vst [vmem:[#allocation2 + $0x58] sm:$0xff] %v517_v52  ;;  %v515_v55 = vadd.f32 %v452_v53, %v338_v51 }
 0x206   :  { %v921_v56 = vpop.f32.mrf.mxu1 }
 0x207   :  { %531 = vst [vmem:[#allocation2 + $0x30] sm:$0xff] %v515_v55  ;;  %v518_v58 = vadd.f32 %v921_v56, %v341_v54 }
 0x208   :  { %v455_v59 = vpop.f32.mrf.mxu1 }
 0x209   :  { %534 = vst [vmem:[#allocation2 + $0x18] sm:$0xff] %v518_v58  ;;  %v516_v61 = vadd.f32 %v455_v59, %v339_v57 }
 0x20a   :  { %v924_v62 = vpop.f32.mrf.mxu1 }
 0x20b   :  { %532 = vst [vmem:[#allocation2] sm:$0xff] %v516_v61  ;;  %v521_v0 = vadd.f32 %v924_v62, %v344_v60 }
 0x20c   :  { %v468_v1 = vpop.f32.mrf.mxu1 }
 0x20d   :  { %537 = vst [vmem:[#allocation2 + $0x8] sm:$0xff] %v521_v0  ;;  %v519_v3 = vadd.f32 %v468_v1, %v342_v63 }
 0x20e   :  { %v925_v4 = vpop.f32.mrf.mxu1 }
 0x20f   :  { %535 = vst [vmem:[#allocation2 + $0x50] sm:$0xff] %v519_v3  ;;  %v522_v6 = vadd.f32 %v925_v4, %v345_v2 }
 0x210   :  { %v471_v7 = vpop.f32.mrf.mxu1 }
 0x211   :  { %538 = vst [vmem:[#allocation2 + $0x48] sm:$0xff] %v522_v6  ;;  %v520_v9 = vadd.f32 %v471_v7, %v343_v5 }
 0x212   :  { %v928_v10 = vpop.f32.mrf.mxu1 }
 0x213   :  { %536 = vst [vmem:[#allocation2 + $0x68] sm:$0xff] %v520_v9  ;;  %v525_v12 = vadd.f32 %v928_v10, %v348_v8 }
 0x214   :  { %v484_v13 = vpop.f32.mrf.mxu1 }
 0x215   :  { %541 = vst [vmem:[#allocation2 + $0x10] sm:$0xff] %v525_v12  ;;  %v523_v15 = vadd.f32 %v484_v13, %v346_v11 }
 0x216   :  { %v929_v16 = vpop.f32.mrf.mxu1 }
 0x217   :  { %539 = vst [vmem:[#allocation2 + $0x40] sm:$0xff] %v523_v15  ;;  %v526_v18 = vadd.f32 %v929_v16, %v349_v14 }
 0x218   :  { %v487_v19 = vpop.f32.mrf.mxu1 }
 0x219   :  { %542 = vst [vmem:[#allocation2 + $0x38] sm:$0xff] %v526_v18  ;;  %v524_v21 = vadd.f32 %v487_v19, %v347_v17 }
 0x21a   :  { %v932_v22 = vpop.f32.mrf.mxu1 }
 0x21b   :  { %540 = vst [vmem:[#allocation2 + $0x20] sm:$0xff] %v524_v21  ;;  %v529_v24 = vadd.f32 %v932_v22, %v352_v20 }
 0x21c   :  { %v500_v25 = vpop.f32.mrf.mxu1 }
 0x21d   :  { %545 = vst [vmem:[#allocation2 + $0x78] sm:$0xff] %v529_v24  ;;  %v527_v27 = vadd.f32 %v500_v25, %v350_v23 }
 0x21e   :  { %v933_v28 = vpop.f32.mrf.mxu1 }
 0x21f   :  { %543 = vst [vmem:[#allocation2 + $0x60] sm:$0xff] %v527_v27  ;;  %v530_v30 = vadd.f32 %v933_v28, %v353_v26 }
 0x220   :  { %v503_v31 = vpop.f32.mrf.mxu1 }
 0x221   :  { %546 = vst [vmem:[#allocation2 + $0x28] sm:$0xff] %v530_v30  ;;  %v528_v32 = vadd.f32 %v503_v31, %v351_v29 }
 0x223   :  { %544 = vst [vmem:[#allocation2 + $0x70] sm:$0xff] %v528_v32 }
 0x224 PF:  { %s547_s7 = sld [smem:[#allocation8]] }
 0x22a   :  { %p756_p4 = scmp.ne.s32.totalorder %s547_s7, 1 }
 0x22c   :  { %551 = sbr.rel (%p756_p4) target bundleno = 577 (0x241), region = 29 }
 0x231   :  { %v552_v33 = vld [vmem:[#allocation2 + $0x30] sm:$0xff]  ;;  %v553_v34 = vld [vmem:[#allocation2] sm:$0xff]  ;;  %v554_v38 = vld [vmem:[#allocation2 + $0x58] sm:$0xff] }
 0x232   :  { %v757_v35 = vld [vmem:[%s1100_s9] ss:$0 sm:$0xff]  ;;  %v555_v39 = vld [vmem:[#allocation2 + $0x18] sm:$0xff]  ;;  %v556_v40 = vld [vmem:[#allocation2 + $0x50] sm:$0xff] }
 0x233   :  { %v575_v36 = vadd.f32 %v757_v35, %v552_v33  ;;  %v576_v37 = vadd.f32 %v757_v35, %v553_v34  ;;  %v577_v41 = vadd.f32 %v757_v35, %v554_v38  ;;  %v578_v42 = vadd.f32 %v757_v35, %v555_v39  ;;  %v557_v43 = vld [vmem:[#allocation2 + $0x68] sm:$0xff]  ;;  %v560_v51 = vld [vmem:[#allocation2 + $0x40] sm:$0xff]  ;;  %v562_v53 = vld [vmem:[#allocation2 + $0x10] sm:$0xff] }
 0x234   :  { %v579_v44 = vadd.f32 %v757_v35, %v556_v40  ;;  %v558_v45 = vld [vmem:[#allocation2 + $0x8] sm:$0xff]  ;;  %v580_v49 = vadd.f32 %v757_v35, %v557_v43  ;;  %v561_v52 = vld [vmem:[#allocation2 + $0x20] sm:$0xff]  ;;  %v563_v58 = vld [vmem:[#allocation2 + $0x38] sm:$0xff]  ;;  %v583_v63 = vadd.f32 %v757_v35, %v560_v51  ;;  %v585_v4 = vadd.f32 %v757_v35, %v562_v53 }
 0x235   :  { %v559_v46 = vld [vmem:[#allocation2 + $0x48] sm:$0xff]  ;;  %v591_v47 = vmax.f32 %v575_v36, 0.0  ;;  %v592_v48 = vmax.f32 %v576_v37, 0.0  ;;  %v581_v50 = vadd.f32 %v757_v35, %v558_v45  ;;  %v593_v54 = vmax.f32 %v577_v41, 0.0  ;;  %v564_v59 = vld [vmem:[#allocation2 + $0x60] sm:$0xff]  ;;  %v565_v0 = vld [vmem:[#allocation2 + $0x70] sm:$0xff] }
 0x236   :  { %v594_v55 = vmax.f32 %v578_v42, 0.0  ;;  %v595_v56 = vmax.f32 %v579_v44, 0.0  ;;  %v582_v57 = vadd.f32 %v757_v35, %v559_v46  ;;  %v596_v61 = vmax.f32 %v580_v49, 0.0  ;;  %v566_v5 = vld [vmem:[#allocation2 + $0x78] sm:$0xff]  ;;  %v567_v6 = vld [vmem:[#allocation2 + $0x28] sm:$0xff] }
 0x237   :  { %v794_v60 = vpack.c.bf16 %v592_v48, %v591_v47  ;;  %v597_v62 = vmax.f32 %v581_v50, 0.0  ;;  %v584_v3 = vadd.f32 %v757_v35, %v561_v52  ;;  %v599_v8 = vmax.f32 %v583_v63, 0.0 }
 0x238   :  { %v799_v1 = vpack.c.bf16 %v594_v55, %v593_v54  ;;  %v598_v2 = vmax.f32 %v582_v57, 0.0  ;;  %v804_v7 = vpack.c.bf16 %v596_v61, %v595_v56  ;;  %v586_v9 = vadd.f32 %v757_v35, %v563_v58 }
 0x239   :  { %795 = vst [vmem:[%s1041_s0] sm:$0xff] %v794_v60   ;;  %v587_v10 = vadd.f32 %v757_v35, %v564_v59  ;;  %v600_v12 = vmax.f32 %v584_v3, 0.0  ;;  %v601_v13 = vmax.f32 %v585_v4, 0.0  ;;  %v588_v14 = vadd.f32 %v757_v35, %v565_v0 }
 0x23a   :  { %831 = vst [vmem:[%s1041_s0 + $0x8] sm:$0xff] %v799_v1   ;;  %v809_v11 = vpack.c.bf16 %v598_v2, %v597_v62  ;;  %832 = vst [vmem:[%s1041_s0 + $0x10] sm:$0xff] %v804_v7   ;;  %v602_v15 = vmax.f32 %v586_v9, 0.0  ;;  %v589_v17 = vadd.f32 %v757_v35, %v566_v5  ;;  %v590_v18 = vadd.f32 %v757_v35, %v567_v6 }
 0x23b   :  { %v603_v16 = vmax.f32 %v587_v10, 0.0  ;;  %v814_v19 = vpack.c.bf16 %v600_v12, %v599_v8  ;;  %v604_v20 = vmax.f32 %v588_v14, 0.0 }
 0x23c   :  { %833 = vst [vmem:[%s1041_s0 + $0x18] sm:$0xff] %v809_v11   ;;  %v819_v21 = vpack.c.bf16 %v602_v15, %v601_v13  ;;  %v605_v22 = vmax.f32 %v589_v17, 0.0  ;;  %v606_v23 = vmax.f32 %v590_v18, 0.0 }
 0x23d   :  { %834 = vst [vmem:[%s1041_s0 + $0x20] sm:$0xff] %v814_v19   ;;  %v824_v24 = vpack.c.bf16 %v604_v20, %v603_v16 }
 0x23e   :  { %835 = vst [vmem:[%s1041_s0 + $0x28] sm:$0xff] %v819_v21   ;;  %v829_v25 = vpack.c.bf16 %v606_v23, %v605_v22 }
 0x23f   :  { %836 = vst [vmem:[%s1041_s0 + $0x30] sm:$0xff] %v824_v24  }
 0x240   :  { %837 = vst [vmem:[%s1041_s0 + $0x38] sm:$0xff] %v829_v25  }
 0x241 PF:  {}

// kernel: _lambda_.3
= control target key start
LH: loop header
LB: loop body
LE: loop exit
PB: predicated region body
PF: predicated region fallthrough
CT: control target
= control target key end

     0   :  { %s1275_s0 = inlined_call_operand.<no memory space> [shape: s32[1], index: 0, kind: input, shape index: {}, may-alias: {0,1,2}]   ;;  %s1276_s1 = inlined_call_operand.<no memory space> [shape: s32[1], index: 1, kind: input, shape index: {}, may-alias: {0,1,2}]   ;;  %s1277_s2 = inlined_call_operand.<no memory space> [shape: s32[1], index: 2, kind: input, shape index: {}, may-alias: {0,1,2}]   ;;  %s1278_s3 = inlined_call_operand.<no memory space> [shape: s32[1], index: 3, kind: input, shape index: {}, may-alias: {3,4,5}]   ;;  %s1279_s4 = inlined_call_operand.<no memory space> [shape: s32[1], index: 4, kind: input, shape index: {}, may-alias: {3,4,5}]   ;;  %s1280_s5 = inlined_call_operand.<no memory space> [shape: s32[1], index: 5, kind: input, shape index: {}, may-alias: {3,4,5}]   ;;  %s1281_s7 = inlined_call_operand.vmem [shape: bf16[128,128], index: 7, kind: input, shape index: {}]   ;;  %s1282_s8 = inlined_call_operand.vmem [shape: bf16[128,128], index: 8, kind: input, shape index: {}]   ;;  %s1283_s9 = inlined_call_operand.vmem [shape: f32[1,128], index: 9, kind: input, shape index: {}]   ;;  %s1284_s10 = inlined_call_operand.vmem [shape: bf16[128,128], index: 10, kind: input, shape index: {}]   ;;  %s1285_s11 = inlined_call_operand.vmem [shape: f32[1,128], index: 11, kind: input, shape index: {}]   ;;  %s1286_s6 = inlined_call_operand.vmem [shape: bf16[1,128,128], index: 6, kind: input, shape index: {}]   ;;  %s1287_s12 = inlined_call_operand.vmem [shape: f32[128,128], index: 12, kind: output, shape index: {}]  }
   0x1   :  { %18 = sst [smem:[#allocation5]] %s1276_s1  ;;  %p60_p0 = scmp.lt.s32.totalorder %s1277_s2, 0 }
   0x2   :  { %21 = sst [smem:[#allocation8]] %s1279_s4  ;;  %s844_s29 = sshll.u32 %s1275_s0, 4 }
   0x3   :  { %22 = sst [smem:[#allocation9]] %s1280_s5  ;;  %p70_p1 = scmp.lt.s32.totalorder %s844_s29, 15 }
   0x4   :  { %s1289_s2 = smov (!%p60_p0, %s1277_s2), 0  ;;  %p846_p2 = scmp.ne.s32.totalorder %s1278_s3, 1 }
   0x5   :  { %s1291_s29 = smov (!%p70_p1, %s844_s29), 15  ;;  %s885_s1 = sshll.u32 %s1289_s2, 6 }
   0x6   :  { %s1166_s18 = scalar_lea.vmem %s1286_s6, %s885_s1  ;;  %s845_s4 = sshll.u32 %s1291_s29, 3 }
   0x7   :  { %s1171_s0 = scalar_lea.vmem %s1287_s12, %s845_s4  ;;  %83 = sbr.rel (%p846_p2) target bundleno = 21 (0x15), region = 29 }
   0xc   :  { %v1079_v0 = vmov 0.0  }
   0xd   :  { %84 = vst [vmem:[#allocation2 + $0x30] sm:$0xff] %v1079_v0  ;;  %85 = vst [vmem:[#allocation2] sm:$0xff] %v1079_v0 }
   0xe   :  { %86 = vst [vmem:[#allocation2 + $0x58] sm:$0xff] %v1079_v0  ;;  %87 = vst [vmem:[#allocation2 + $0x18] sm:$0xff] %v1079_v0 }
   0xf   :  { %88 = vst [vmem:[#allocation2 + $0x50] sm:$0xff] %v1079_v0  ;;  %89 = vst [vmem:[#allocation2 + $0x68] sm:$0xff] %v1079_v0 }
  0x10   :  { %90 = vst [vmem:[#allocation2 + $0x8] sm:$0xff] %v1079_v0  ;;  %91 = vst [vmem:[#allocation2 + $0x48] sm:$0xff] %v1079_v0 }
  0x11   :  { %92 = vst [vmem:[#allocation2 + $0x40] sm:$0xff] %v1079_v0  ;;  %93 = vst [vmem:[#allocation2 + $0x20] sm:$0xff] %v1079_v0 }
  0x12   :  { %94 = vst [vmem:[#allocation2 + $0x10] sm:$0xff] %v1079_v0  ;;  %95 = vst [vmem:[#allocation2 + $0x38] sm:$0xff] %v1079_v0 }
  0x13   :  { %96 = vst [vmem:[#allocation2 + $0x60] sm:$0xff] %v1079_v0  ;;  %97 = vst [vmem:[#allocation2 + $0x70] sm:$0xff] %v1079_v0 }
  0x14   :  { %98 = vst [vmem:[#allocation2 + $0x78] sm:$0xff] %v1079_v0  ;;  %99 = vst [vmem:[#allocation2 + $0x28] sm:$0xff] %v1079_v0 }
  0x15 PF:  { %s100_s2 = sld [smem:[#allocation9]] }
  0x1b   :  { %p847_p3 = scmp.ne.s32.totalorder %s100_s2, 1 }
  0x1c   :  { %s105_s27 = sld [smem:[#allocation5]] (!%p847_p3) }
  0x1d   :  { %104 = sbr.rel (%p847_p3) target bundleno = 548 (0x224), region = 33 }
  0x22   :  { %v1047_v1 = vld [vmem:[%s1282_s8 + $0x38] sm:$0xff]   ;;  %v1048_v2 = vld [vmem:[%s1282_s8 + $0x30] sm:$0xff]   ;;  %v1049_v3 = vld [vmem:[%s1282_s8 + $0x28] sm:$0xff]   ;;  %s848_s30 = sshll.u32 %s105_s27, 7 }
  0x23   :  { %934 = vmatprep.subr.bf16.mxu0 %v1047_v1  ;;  %v1050_v4 = vld [vmem:[%s1282_s8 + $0x20] sm:$0xff]   ;;  %v1051_v5 = vld [vmem:[%s1282_s8 + $0x18] sm:$0xff]   ;;  %s107_s13 = sshra.s32 %s848_s30, 3  ;;  %v1052_v6 = vld [vmem:[%s1282_s8 + $0x10] sm:$0xff]  }
  0x24   :  { %935 = vmatpush3.bf16.msra.mxu0 %v1047_v1  ;;  %s849_s1 = sshll.u32 %s107_s13, 2  ;;  %v1053_v8 = vld [vmem:[%s1282_s8 + $0x8] sm:$0xff]   ;;  %v1054_v9 = vld [vmem:[%s1282_s8] sm:$0xff]   ;;  %v1065_v43 = vld [vmem:[%s1166_s18 + $0x10] sm:$0xff]  }
  0x25   :  { %936 = vmatprep.subr.bf16.mxu0 %v1048_v2  ;;  %s110_s4 = scalar_lea.vmem %s1281_s7, %s849_s1  ;;  %v1063_v17 = vld [vmem:[%s1166_s18] sm:$0xff]   ;;  %v1064_v42 = vld [vmem:[%s1166_s18 + $0x8] sm:$0xff]   ;;  %v1066_v44 = vld [vmem:[%s1166_s18 + $0x18] sm:$0xff]  }
  0x26   :  { %v1055_v7 = vld [vmem:[%s110_s4] sm:$0xff]   ;;  %v1056_v10 = vld [vmem:[%s110_s4 + $0x8] sm:$0xff]   ;;  %v1057_v11 = vld [vmem:[%s110_s4 + $0x10] sm:$0xff]   ;;  %982 = vmatprep.mubr.bf16.mxu1 %v1063_v17 }
  0x27   :  { %950 = vmatprep.mubr.bf16.mxu0 %v1055_v7  ;;  %v1058_v12 = vld [vmem:[%s110_s4 + $0x18] sm:$0xff]   ;;  %v1059_v13 = vld [vmem:[%s110_s4 + $0x20] sm:$0xff]   ;;  %v1060_v14 = vld [vmem:[%s110_s4 + $0x28] sm:$0xff]  }
  0x28   :  { %937 = vmatpush3.bf16.msra.mxu0 %v1048_v2  ;;  %v1061_v15 = vld [vmem:[%s110_s4 + $0x30] sm:$0xff]   ;;  %v1062_v16 = vld [vmem:[%s110_s4 + $0x38] sm:$0xff]   ;;  %v1067_v45 = vld [vmem:[%s1166_s18 + $0x20] sm:$0xff]  }
  0x29   :  { %938 = vmatprep.subr.bf16.mxu0 %v1049_v3  ;;  %v1068_v46 = vld [vmem:[%s1166_s18 + $0x28] sm:$0xff]   ;;  %v1069_v47 = vld [vmem:[%s1166_s18 + $0x30] sm:$0xff]   ;;  %v1070_v48 = vld [vmem:[%s1166_s18 + $0x38] sm:$0xff]  }
  0x2a   :  { %v346_v49 = vld [vmem:[#allocation2 + $0x58] sm:$0xff]  ;;  %v344_v51 = vld [vmem:[#allocation2 + $0x30] sm:$0xff]  ;;  %v345_v57 = vld [vmem:[#allocation2] sm:$0xff] }
  0x2b   :  { %v347_v54 = vld [vmem:[#allocation2 + $0x18] sm:$0xff]  ;;  %v350_v60 = vld [vmem:[#allocation2 + $0x8] sm:$0xff]  ;;  %v348_v63 = vld [vmem:[#allocation2 + $0x50] sm:$0xff] }
  0x2c   :  { %939 = vmatpush3.bf16.msra.mxu0 %v1049_v3  ;;  %v351_v2 = vld [vmem:[#allocation2 + $0x48] sm:$0xff]  ;;  %v353_v17 = vld [vmem:[#allocation2 + $0x20] sm:$0xff] }
  0x2d   :  { %940 = vmatprep.subr.bf16.mxu0 %v1050_v4 }
  0x30   :  { %941 = vmatpush3.bf16.msra.mxu0 %v1050_v4 }
  0x31   :  { %942 = vmatprep.subr.bf16.mxu0 %v1051_v5 }
  0x34   :  { %943 = vmatpush3.bf16.msra.mxu0 %v1051_v5  ;;  %v349_v5 = vld [vmem:[#allocation2 + $0x68] sm:$0xff] }
  0x35   :  { %944 = vmatprep.subr.bf16.mxu0 %v1052_v6 }
  0x38   :  { %945 = vmatpush3.bf16.msra.mxu0 %v1052_v6 }
  0x39   :  { %946 = vmatprep.subr.bf16.mxu0 %v1053_v8 }
  0x3c   :  { %947 = vmatpush3.bf16.msra.mxu0 %v1053_v8  ;;  %v354_v8 = vld [vmem:[#allocation2 + $0x10] sm:$0xff] }
  0x3d   :  { %948 = vmatprep.subr.bf16.mxu0 %v1054_v9 }
  0x40   :  { %949 = vmatpush3.bf16.msra.mxu0 %v1054_v9 }
  0x43   :  { %951 = vmatmul.mubr.bf16.vlgmr.msra.gmra.mxu0 %v1056_v10 }
  0x44   :  { %954 = vmatprep.mubr.bf16.mxu0 %v1057_v11  ;;  %v352_v11 = vld [vmem:[#allocation2 + $0x40] sm:$0xff] }
  0x4b   :  { %955 = vmatmul.mubr.bf16.gmra.mxu0 %v1058_v12 }
  0x4c   :  { %958 = vmatprep.mubr.bf16.mxu0 %v1059_v13 }
  0x53   :  { %959 = vmatmul.mubr.bf16.gmra.mxu0 %v1060_v14  ;;  %v355_v14 = vld [vmem:[#allocation2 + $0x38] sm:$0xff] }
  0x54   :  { %962 = vmatprep.mubr.bf16.mxu0 %v1061_v15 }
  0x5b   :  { %963 = vmatmul.mubr.bf16.gmra.mxu0 %v1062_v16 }
 0x103   :  { %v952_v18 = vpop.f32.mrf.mxu0 }
 0x105   :  { %v273_v19 = vpop.f32.mrf.mxu0 }
 0x107   :  { %v953_v20 = vpop.f32.mrf.mxu0 }
 0x108   :  { %v337_v40 = vpack.c.bf16 %v953_v20, %v952_v18  ;;  %v358_v20 = vld [vmem:[#allocation2 + $0x78] sm:$0xff] }
 0x109   :  { %v276_v21 = vpop.f32.mrf.mxu0 }
 0x10a   :  { %v336_v41 = vpack.c.bf16 %v276_v21, %v273_v19 }
 0x10b   :  { %v956_v22 = vpop.f32.mrf.mxu0 }
 0x10d   :  { %v289_v23 = vpop.f32.mrf.mxu0 }
 0x10f   :  { %v957_v24 = vpop.f32.mrf.mxu0 }
 0x110   :  { %v339_v38 = vpack.c.bf16 %v957_v24, %v956_v22 }
 0x111   :  { %v292_v25 = vpop.f32.mrf.mxu0 }
 0x112   :  { %v338_v39 = vpack.c.bf16 %v292_v25, %v289_v23  ;;  %v356_v23 = vld [vmem:[#allocation2 + $0x60] sm:$0xff] }
 0x113   :  { %v960_v26 = vpop.f32.mrf.mxu0 }
 0x115   :  { %v305_v27 = vpop.f32.mrf.mxu0 }
 0x117   :  { %v961_v28 = vpop.f32.mrf.mxu0 }
 0x118   :  { %v341_v36 = vpack.c.bf16 %v961_v28, %v960_v26  ;;  %v359_v26 = vld [vmem:[#allocation2 + $0x28] sm:$0xff] }
 0x119   :  { %v308_v29 = vpop.f32.mrf.mxu0 }
 0x11a   :  { %v340_v37 = vpack.c.bf16 %v308_v29, %v305_v27  ;;  %v357_v29 = vld [vmem:[#allocation2 + $0x70] sm:$0xff] }
 0x11b   :  { %v964_v30 = vpop.f32.mrf.mxu0 }
 0x11d   :  { %v321_v31 = vpop.f32.mrf.mxu0 }
 0x11f   :  { %v965_v32 = vpop.f32.mrf.mxu0 }
 0x120   :  { %v343_v33 = vpack.c.bf16 %v965_v32, %v964_v30 }
 0x121   :  { %v324_v34 = vpop.f32.mrf.mxu0 }
 0x122   :  { %v342_v35 = vpack.c.bf16 %v324_v34, %v321_v31  ;;  %966 = vmatprep.subr.bf16.mxu1 %v343_v33 }
 0x123   :  { %967 = vmatpush3.bf16.msra.mxu1 %v343_v33 }
 0x124   :  { %968 = vmatprep.subr.bf16.mxu1 %v342_v35 }
 0x127   :  { %969 = vmatpush3.bf16.msra.mxu1 %v342_v35 }
 0x128   :  { %970 = vmatprep.subr.bf16.mxu1 %v341_v36 }
 0x12b   :  { %971 = vmatpush3.bf16.msra.mxu1 %v341_v36 }
 0x12c   :  { %972 = vmatprep.subr.bf16.mxu1 %v340_v37 }
 0x12f   :  { %973 = vmatpush3.bf16.msra.mxu1 %v340_v37 }
 0x130   :  { %974 = vmatprep.subr.bf16.mxu1 %v339_v38 }
 0x133   :  { %975 = vmatpush3.bf16.msra.mxu1 %v339_v38 }
 0x134   :  { %976 = vmatprep.subr.bf16.mxu1 %v338_v39 }
 0x137   :  { %977 = vmatpush3.bf16.msra.mxu1 %v338_v39 }
 0x138   :  { %978 = vmatprep.subr.bf16.mxu1 %v337_v40 }
 0x13b   :  { %979 = vmatpush3.bf16.msra.mxu1 %v337_v40 }
 0x13c   :  { %980 = vmatprep.subr.bf16.mxu1 %v336_v41 }
 0x13f   :  { %981 = vmatpush3.bf16.msra.mxu1 %v336_v41 }
 0x142   :  { %983 = vmatmul.mubr.bf16.vlgmr.msra.gmra.mxu1 %v1064_v42 }
 0x143   :  { %986 = vmatprep.mubr.bf16.mxu1 %v1065_v43 }
 0x14a   :  { %987 = vmatmul.mubr.bf16.gmra.mxu1 %v1066_v44 }
 0x14b   :  { %990 = vmatprep.mubr.bf16.mxu1 %v1067_v45 }
 0x152   :  { %991 = vmatmul.mubr.bf16.gmra.mxu1 %v1068_v46 }
 0x153   :  { %994 = vmatprep.mubr.bf16.mxu1 %v1069_v47 }
 0x15a   :  { %995 = vmatmul.mubr.bf16.gmra.mxu1 %v1070_v48 }
 0x202   :  { %v984_v50 = vpop.f32.mrf.mxu1 }
 0x203   :  { %v523_v52 = vadd.f32 %v984_v50, %v346_v49 }
 0x204   :  { %v458_v53 = vpop.f32.mrf.mxu1 }
 0x205   :  { %539 = vst [vmem:[#allocation2 + $0x58] sm:$0xff] %v523_v52  ;;  %v521_v55 = vadd.f32 %v458_v53, %v344_v51 }
 0x206   :  { %v985_v56 = vpop.f32.mrf.mxu1 }
 0x207   :  { %537 = vst [vmem:[#allocation2 + $0x30] sm:$0xff] %v521_v55  ;;  %v524_v58 = vadd.f32 %v985_v56, %v347_v54 }
 0x208   :  { %v461_v59 = vpop.f32.mrf.mxu1 }
 0x209   :  { %540 = vst [vmem:[#allocation2 + $0x18] sm:$0xff] %v524_v58  ;;  %v522_v61 = vadd.f32 %v461_v59, %v345_v57 }
 0x20a   :  { %v988_v62 = vpop.f32.mrf.mxu1 }
 0x20b   :  { %538 = vst [vmem:[#allocation2] sm:$0xff] %v522_v61  ;;  %v527_v0 = vadd.f32 %v988_v62, %v350_v60 }
 0x20c   :  { %v474_v1 = vpop.f32.mrf.mxu1 }
 0x20d   :  { %543 = vst [vmem:[#allocation2 + $0x8] sm:$0xff] %v527_v0  ;;  %v525_v3 = vadd.f32 %v474_v1, %v348_v63 }
 0x20e   :  { %v989_v4 = vpop.f32.mrf.mxu1 }
 0x20f   :  { %541 = vst [vmem:[#allocation2 + $0x50] sm:$0xff] %v525_v3  ;;  %v528_v6 = vadd.f32 %v989_v4, %v351_v2 }
 0x210   :  { %v477_v7 = vpop.f32.mrf.mxu1 }
 0x211   :  { %544 = vst [vmem:[#allocation2 + $0x48] sm:$0xff] %v528_v6  ;;  %v526_v9 = vadd.f32 %v477_v7, %v349_v5 }
 0x212   :  { %v992_v10 = vpop.f32.mrf.mxu1 }
 0x213   :  { %542 = vst [vmem:[#allocation2 + $0x68] sm:$0xff] %v526_v9  ;;  %v531_v12 = vadd.f32 %v992_v10, %v354_v8 }
 0x214   :  { %v490_v13 = vpop.f32.mrf.mxu1 }
 0x215   :  { %547 = vst [vmem:[#allocation2 + $0x10] sm:$0xff] %v531_v12  ;;  %v529_v15 = vadd.f32 %v490_v13, %v352_v11 }
 0x216   :  { %v993_v16 = vpop.f32.mrf.mxu1 }
 0x217   :  { %545 = vst [vmem:[#allocation2 + $0x40] sm:$0xff] %v529_v15  ;;  %v532_v18 = vadd.f32 %v993_v16, %v355_v14 }
 0x218   :  { %v493_v19 = vpop.f32.mrf.mxu1 }
 0x219   :  { %548 = vst [vmem:[#allocation2 + $0x38] sm:$0xff] %v532_v18  ;;  %v530_v21 = vadd.f32 %v493_v19, %v353_v17 }
 0x21a   :  { %v996_v22 = vpop.f32.mrf.mxu1 }
 0x21b   :  { %546 = vst [vmem:[#allocation2 + $0x20] sm:$0xff] %v530_v21  ;;  %v535_v24 = vadd.f32 %v996_v22, %v358_v20 }
 0x21c   :  { %v506_v25 = vpop.f32.mrf.mxu1 }
 0x21d   :  { %551 = vst [vmem:[#allocation2 + $0x78] sm:$0xff] %v535_v24  ;;  %v533_v27 = vadd.f32 %v506_v25, %v356_v23 }
 0x21e   :  { %v997_v28 = vpop.f32.mrf.mxu1 }
 0x21f   :  { %549 = vst [vmem:[#allocation2 + $0x60] sm:$0xff] %v533_v27  ;;  %v536_v30 = vadd.f32 %v997_v28, %v359_v26 }
 0x220   :  { %v509_v31 = vpop.f32.mrf.mxu1 }
 0x221   :  { %552 = vst [vmem:[#allocation2 + $0x28] sm:$0xff] %v536_v30  ;;  %v534_v32 = vadd.f32 %v509_v31, %v357_v29 }
 0x223   :  { %550 = vst [vmem:[#allocation2 + $0x70] sm:$0xff] %v534_v32 }
 0x224 PF:  { %s553_s7 = sld [smem:[#allocation8]] }
 0x22a   :  { %p874_p4 = scmp.ne.s32.totalorder %s553_s7, 1 }
 0x22c   :  { %557 = sbr.rel (%p874_p4) target bundleno = 804 (0x324), region = 37 }
 0x231   :  { %v1071_v33 = vld [vmem:[%s1284_s10 + $0x38] sm:$0xff]   ;;  %v1072_v34 = vld [vmem:[%s1284_s10 + $0x30] sm:$0xff]   ;;  %v1073_v35 = vld [vmem:[%s1284_s10 + $0x28] sm:$0xff]  }
 0x232   :  { %998 = vmatprep.subr.bf16.mxu0 %v1071_v33  ;;  %1030 = vmatprep.subr.bf16.mxu1 %v1071_v33  ;;  %v1074_v36 = vld [vmem:[%s1284_s10 + $0x20] sm:$0xff]   ;;  %v558_v37 = vld [vmem:[#allocation2 + $0x30] sm:$0xff]  ;;  %v1075_v48 = vld [vmem:[%s1284_s10 + $0x18] sm:$0xff]  }
 0x233   :  { %999 = vmatpush3.bf16.msra.mxu0 %v1071_v33  ;;  %1038 = vmatpush3.bf16.msra.mxu1 %v1071_v33  ;;  %v559_v38 = vld [vmem:[#allocation2] sm:$0xff]  ;;  %v1076_v53 = vld [vmem:[%s1284_s10 + $0x10] sm:$0xff]   ;;  %v1077_v54 = vld [vmem:[%s1284_s10 + $0x8] sm:$0xff]  }
 0x234   :  { %1000 = vmatprep.subr.bf16.mxu0 %v1072_v34  ;;  %1031 = vmatprep.subr.bf16.mxu1 %v1072_v34  ;;  %v1226_v39 = vld [vmem:[%s1283_s9] ss:$0 sm:$0xff]  ;;  %v560_v55 = vld [vmem:[#allocation2 + $0x58] sm:$0xff]  ;;  %v568_v57 = vld [vmem:[#allocation2 + $0x10] sm:$0xff] }
 0x235   :  { %v581_v40 = vadd.f32 %v1226_v39, %v558_v37  ;;  %v582_v41 = vadd.f32 %v1226_v39, %v559_v38  ;;  %v566_v42 = vld [vmem:[#allocation2 + $0x40] sm:$0xff]  ;;  %v561_v56 = vld [vmem:[#allocation2 + $0x18] sm:$0xff]  ;;  %v562_v59 = vld [vmem:[#allocation2 + $0x50] sm:$0xff]  ;;  %v583_v63 = vadd.f32 %v1226_v39, %v560_v55  ;;  %v591_v1 = vadd.f32 %v1226_v39, %v568_v57 }
 0x236   :  { %v567_v43 = vld [vmem:[#allocation2 + $0x20] sm:$0xff]  ;;  %v589_v44 = vadd.f32 %v1226_v39, %v566_v42  ;;  %v569_v58 = vld [vmem:[#allocation2 + $0x38] sm:$0xff]  ;;  %v563_v60 = vld [vmem:[#allocation2 + $0x68] sm:$0xff]  ;;  %v584_v0 = vadd.f32 %v1226_v39, %v561_v56  ;;  %v585_v3 = vadd.f32 %v1226_v39, %v562_v59 }
 0x237   :  { %1001 = vmatpush3.bf16.msra.mxu0 %v1072_v34  ;;  %1039 = vmatpush3.bf16.msra.mxu1 %v1072_v34  ;;  %v590_v45 = vadd.f32 %v1226_v39, %v567_v43  ;;  %v597_v46 = vmax.f32 %v581_v40, 0.0  ;;  %v598_v47 = vmax.f32 %v582_v41, 0.0  ;;  %v570_v61 = vld [vmem:[#allocation2 + $0x60] sm:$0xff]  ;;  %v571_v62 = vld [vmem:[#allocation2 + $0x70] sm:$0xff]  ;;  %v592_v2 = vadd.f32 %v1226_v39, %v569_v58  ;;  %v564_v12 = vld [vmem:[#allocation2 + $0x8] sm:$0xff] }
 0x238   :  { %1002 = vmatprep.subr.bf16.mxu0 %v1073_v35  ;;  %1032 = vmatprep.subr.bf16.mxu1 %v1073_v35  ;;  %v605_v49 = vmax.f32 %v589_v44, 0.0  ;;  %v586_v4 = vadd.f32 %v1226_v39, %v563_v60  ;;  %v593_v5 = vadd.f32 %v1226_v39, %v570_v61  ;;  %v594_v6 = vadd.f32 %v1226_v39, %v571_v62  ;;  %v1078_v7 = vld [vmem:[%s1284_s10] sm:$0xff]   ;;  %v565_v13 = vld [vmem:[#allocation2 + $0x48] sm:$0xff]  ;;  %v572_v18 = vld [vmem:[#allocation2 + $0x78] sm:$0xff] }
 0x239   :  { %v606_v50 = vmax.f32 %v590_v45, 0.0  ;;  %v613_v51 = vpack.c.bf16 %v598_v47, %v597_v46  ;;  %v599_v8 = vmax.f32 %v583_v63, 0.0  ;;  %v600_v9 = vmax.f32 %v584_v0, 0.0  ;;  %v573_v19 = vld [vmem:[#allocation2 + $0x28] sm:$0xff]  ;;  %v876_v34 = vld [vmem:[%s1285_s11] ss:$0 sm:$0xff] }
 0x23a   :  { %v607_v10 = vmax.f32 %v591_v1, 0.0  ;;  %v608_v11 = vmax.f32 %v592_v2, 0.0  ;;  %v601_v14 = vmax.f32 %v585_v3, 0.0  ;;  %v602_v15 = vmax.f32 %v586_v4, 0.0 }
 0x23b   :  { %1003 = vmatpush3.bf16.msra.mxu0 %v1073_v35  ;;  %1040 = vmatpush3.bf16.msra.mxu1 %v1073_v35  ;;  %v617_v52 = vpack.c.bf16 %v606_v50, %v605_v49  ;;  %v609_v16 = vmax.f32 %v593_v5, 0.0  ;;  %v610_v17 = vmax.f32 %v594_v6, 0.0  ;;  %v614_v20 = vpack.c.bf16 %v600_v9, %v599_v8 }
 0x23c   :  { %1004 = vmatprep.subr.bf16.mxu0 %v1074_v36  ;;  %1033 = vmatprep.subr.bf16.mxu1 %v1074_v36  ;;  %v587_v21 = vadd.f32 %v1226_v39, %v564_v12  ;;  %v618_v22 = vpack.c.bf16 %v608_v11, %v607_v10  ;;  %v588_v23 = vadd.f32 %v1226_v39, %v565_v13 }
 0x23d   :  { %1014 = vmatprep.mubr.bf16.mxu0 %v613_v51  ;;  %1022 = vmatprep.mubr.bf16.mxu1 %v617_v52  ;;  %v595_v24 = vadd.f32 %v1226_v39, %v572_v18  ;;  %v596_v25 = vadd.f32 %v1226_v39, %v573_v19  ;;  %v615_v26 = vpack.c.bf16 %v602_v15, %v601_v14 }
 0x23e   :  { %v619_v27 = vpack.c.bf16 %v610_v17, %v609_v16  ;;  %v603_v28 = vmax.f32 %v587_v21, 0.0  ;;  %v604_v29 = vmax.f32 %v588_v23, 0.0 }
 0x23f   :  { %1005 = vmatpush3.bf16.msra.mxu0 %v1074_v36  ;;  %1041 = vmatpush3.bf16.msra.mxu1 %v1074_v36  ;;  %v611_v30 = vmax.f32 %v595_v24, 0.0  ;;  %v612_v31 = vmax.f32 %v596_v25, 0.0 }
 0x240   :  { %1006 = vmatprep.subr.bf16.mxu0 %v1075_v48  ;;  %1034 = vmatprep.subr.bf16.mxu1 %v1075_v48  ;;  %v616_v32 = vpack.c.bf16 %v604_v29, %v603_v28 }
 0x241   :  { %v620_v33 = vpack.c.bf16 %v612_v31, %v611_v30 }
 0x243   :  { %1007 = vmatpush3.bf16.msra.mxu0 %v1075_v48  ;;  %1042 = vmatpush3.bf16.msra.mxu1 %v1075_v48 }
 0x244   :  { %1008 = vmatprep.subr.bf16.mxu0 %v1076_v53  ;;  %1035 = vmatprep.subr.bf16.mxu1 %v1076_v53 }
 0x247   :  { %1009 = vmatpush3.bf16.msra.mxu0 %v1076_v53  ;;  %1043 = vmatpush3.bf16.msra.mxu1 %v1076_v53 }
 0x248   :  { %1010 = vmatprep.subr.bf16.mxu0 %v1077_v54  ;;  %1036 = vmatprep.subr.bf16.mxu1 %v1077_v54 }
 0x24b   :  { %1011 = vmatpush3.bf16.msra.mxu0 %v1077_v54  ;;  %1044 = vmatpush3.bf16.msra.mxu1 %v1077_v54 }
 0x24c   :  { %1012 = vmatprep.subr.bf16.mxu0 %v1078_v7  ;;  %1037 = vmatprep.subr.bf16.mxu1 %v1078_v7 }
 0x24f   :  { %1013 = vmatpush3.bf16.msra.mxu0 %v1078_v7  ;;  %1045 = vmatpush3.bf16.msra.mxu1 %v1078_v7 }
 0x252   :  { %1015 = vmatmul.mubr.bf16.vlgmr.msra.gmra.mxu0 %v614_v20  ;;  %1023 = vmatmul.mubr.bf16.vlgmr.msra.gmra.mxu1 %v618_v22 }
 0x253   :  { %1018 = vmatprep.mubr.bf16.mxu0 %v615_v26  ;;  %1026 = vmatprep.mubr.bf16.mxu1 %v619_v27 }
 0x25a   :  { %1019 = vmatmul.mubr.bf16.gmra.mxu0 %v616_v32  ;;  %1027 = vmatmul.mubr.bf16.gmra.mxu1 %v620_v33 }
 0x312   :  { %v1016_v35 = vpop.f32.mrf.mxu0  ;;  %v1024_v36 = vpop.f32.mrf.mxu1 }
 0x313   :  { %v735_v37 = vadd.f32 %v1016_v35, %v876_v34  ;;  %v767_v38 = vadd.f32 %v1024_v36, %v876_v34 }
 0x314   :  { %v726_v39 = vpop.f32.mrf.mxu0  ;;  %v758_v40 = vpop.f32.mrf.mxu1 }
 0x315   :  { %791 = vst [vmem:[%s1171_s0 + $0x10] sm:$0xff] %v735_v37  ;;  %799 = vst [vmem:[%s1171_s0 + $0x50] sm:$0xff] %v767_v38  ;;  %v727_v41 = vadd.f32 %v876_v34, %v726_v39  ;;  %v759_v42 = vadd.f32 %v876_v34, %v758_v40 }
 0x316   :  { %v1017_v43 = vpop.f32.mrf.mxu0  ;;  %v1025_v44 = vpop.f32.mrf.mxu1 }
 0x317   :  { %789 = vst [vmem:[%s1171_s0] sm:$0xff] %v727_v41  ;;  %797 = vst [vmem:[%s1171_s0 + $0x40] sm:$0xff] %v759_v42  ;;  %v738_v45 = vadd.f32 %v1017_v43, %v876_v34  ;;  %v770_v46 = vadd.f32 %v1025_v44, %v876_v34 }
 0x318   :  { %v729_v47 = vpop.f32.mrf.mxu0  ;;  %v761_v48 = vpop.f32.mrf.mxu1 }
 0x319   :  { %792 = vst [vmem:[%s1171_s0 + $0x18] sm:$0xff] %v738_v45  ;;  %800 = vst [vmem:[%s1171_s0 + $0x58] sm:$0xff] %v770_v46  ;;  %v730_v49 = vadd.f32 %v876_v34, %v729_v47  ;;  %v762_v50 = vadd.f32 %v876_v34, %v761_v48 }
 0x31a   :  { %v1020_v51 = vpop.f32.mrf.mxu0  ;;  %v1028_v52 = vpop.f32.mrf.mxu1 }
 0x31b   :  { %790 = vst [vmem:[%s1171_s0 + $0x8] sm:$0xff] %v730_v49  ;;  %798 = vst [vmem:[%s1171_s0 + $0x48] sm:$0xff] %v762_v50  ;;  %v751_v53 = vadd.f32 %v1020_v51, %v876_v34  ;;  %v783_v54 = vadd.f32 %v1028_v52, %v876_v34 }
 0x31c   :  { %v742_v55 = vpop.f32.mrf.mxu0  ;;  %v774_v56 = vpop.f32.mrf.mxu1 }
 0x31d   :  { %795 = vst [vmem:[%s1171_s0 + $0x30] sm:$0xff] %v751_v53  ;;  %803 = vst [vmem:[%s1171_s0 + $0x70] sm:$0xff] %v783_v54  ;;  %v743_v57 = vadd.f32 %v876_v34, %v742_v55  ;;  %v775_v58 = vadd.f32 %v876_v34, %v774_v56 }
 0x31e   :  { %v1021_v59 = vpop.f32.mrf.mxu0  ;;  %v1029_v60 = vpop.f32.mrf.mxu1 }
 0x31f   :  { %793 = vst [vmem:[%s1171_s0 + $0x20] sm:$0xff] %v743_v57  ;;  %801 = vst [vmem:[%s1171_s0 + $0x60] sm:$0xff] %v775_v58  ;;  %v754_v61 = vadd.f32 %v1021_v59, %v876_v34  ;;  %v786_v62 = vadd.f32 %v1029_v60, %v876_v34 }
 0x320   :  { %v745_v63 = vpop.f32.mrf.mxu0  ;;  %v777_v0 = vpop.f32.mrf.mxu1 }
 0x321   :  { %796 = vst [vmem:[%s1171_s0 + $0x38] sm:$0xff] %v754_v61  ;;  %804 = vst [vmem:[%s1171_s0 + $0x78] sm:$0xff] %v786_v62  ;;  %v746_v1 = vadd.f32 %v876_v34, %v745_v63  ;;  %v778_v2 = vadd.f32 %v876_v34, %v777_v0 }
 0x323   :  { %794 = vst [vmem:[%s1171_s0 + $0x28] sm:$0xff] %v746_v1  ;;  %802 = vst [vmem:[%s1171_s0 + $0x68] sm:$0xff] %v778_v2 }
 0x324 PF:  {}

</bundles_post_ra>
